<compile_context>
chip_gen: v6e
topology: v6e:2x2x1
jax: 0.10.0
libtpu: 0.0.40
codegen_flags: <defaults>
</compile_context>

<pallas_src>
import functools

import numpy as np
import jax
import jax.numpy as jnp
from jax import lax
from jax.experimental import pallas as pl
from jax.experimental.pallas import tpu as pltpu


# ----------------------------------------------------------------------------
# Pallas kernel: fused upsample + concat + full C2f, lane-packed (rows, W*C)
# ----------------------------------------------------------------------------
def _decoder_kernel(x_ref, x0_ref,
                    uh_ref, mx_ref, mx0_ref, sup_ref, sdn_ref,
                    thA_ref, auxA_ref, wA_ref,
                    thB_ref, auxB_ref, wB_ref,
                    thC_ref, auxC_ref, wC_ref,
                    o_ref, *, shortcut, mm_dtype):
    f32 = jnp.float32

    def mdot(a, b):
        # MXU matmul with mm_dtype operands and f32 accumulation.
        return jnp.dot(a.astype(mm_dtype), b.astype(mm_dtype),
                       preferred_element_type=f32)

    sup = sup_ref[...]       # (R, R) 0/1 "row above, same image" shift matrix
    sdn = sdn_ref[...]       # (R, R) 0/1 "row below, same image" shift matrix

    def conv_block(feat, th_ref, aux_ref, w_ref):
        # ConvBlock with BN folded:  relu( pw_1x1( relu( plus-stencil(feat) + bias ) ) )
        #   th    : (L, L)   banded lane matrix = center/left/right taps (edges baked in)
        #   aux   : (3, L)   [up tap, down tap, BN bias], tiled per lane, f32
        #   w     : (L, Lo)  block-diagonal 1x1 pw-conv weights
        aux = aux_ref[...]
        s = (mdot(feat, th_ref[...])                 # dw + horizontal 1x3 taps
             + mdot(sup, feat * aux[0:1])            # vertical tap: row above
             + mdot(sdn, feat * aux[1:2])            # vertical tap: row below
             + aux[2:3])                             # folded BN shift
        s = jnp.maximum(s, 0.0)                      # relu(BN(dw + hori + vert))
        return jnp.maximum(mdot(s, w_ref[...]), 0.0)  # relu(pw_conv)

    # Fused bilinear 2x upsample (rows, then cols) + channel concat with x0.
    x = x_ref[...]                                          # (Bb*H,  W*C0)  f32
    x0 = x0_ref[...]                                        # (Bb*Hh, Wh*C0) f32
    uph = mdot(uh_ref[...], x)                              # rows upsampled
    cat = mdot(uph, mx_ref[...]) + mdot(x0, mx0_ref[...])   # (Bb*Hh, Wh*Cin)

    # C2f: bottleneck (Cin -> Cin//4 -> Cin) (+shortcut), then conv_up (Cin -> Cout).
    a = conv_block(cat, thA_ref, auxA_ref, wA_ref)
    b = conv_block(a, thB_ref, auxB_ref, wB_ref)
    h = b + cat if shortcut else b
    out = conv_block(h, thC_ref, auxC_ref, wC_ref)          # (Bb*Hh, Wh*Cout)
    o_ref[...] = out.astype(o_ref.dtype)                    # lane-dense store


# ----------------------------------------------------------------------------
# Constant-matrix builders (host-side numpy) and parameter packing (jnp)
# ----------------------------------------------------------------------------
def _upsample_matrix(n):
    # PyTorch nn.Upsample(scale_factor=2, mode='bilinear', align_corners=False):
    #   out[2k]   = 0.25*in[k-1] + 0.75*in[k]   (indices clamped at the border)
    #   out[2k+1] = 0.75*in[k]   + 0.25*in[k+1]
    u = np.zeros((2 * n, n), np.float32)
    for k in range(n):
        u[2 * k, max(k - 1, 0)] += 0.25
        u[2 * k, k] += 0.75
        u[2 * k + 1, k] += 0.75
        u[2 * k + 1, min(k + 1, n - 1)] += 0.25
    return u


def _pack_convblock(p, Wh, mm_dtype):
    # Fold eval-mode BN into the 5 depthwise taps, then pack to the lane-packed layout.
    bn_s, bn_sh = p['bn_s'], p['bn_sh']
    t_c = bn_s * (p['dw_w'] + p['hori_w'][:, 1] + p['vert_w'][:, 1])   # center
    t_l = bn_s * p['hori_w'][:, 0]                                     # left  (w-1)
    t_r = bn_s * p['hori_w'][:, 2]                                     # right (w+1)
    t_u = bn_s * p['vert_w'][:, 0]                                     # up    (h-1)
    t_d = bn_s * p['vert_w'][:, 2]                                     # down  (h+1)
    eye0 = jnp.eye(Wh, dtype=jnp.float32)
    # Banded lane matrix: [(w)*C+c, w*C+c]=center, [(w-1)*C+c, w*C+c]=left,
    # [(w+1)*C+c, w*C+c]=right; missing off-diagonal blocks give the zero border.
    th = (jnp.kron(eye0, jnp.diag(t_c))
          + jnp.kron(jnp.eye(Wh, k=1, dtype=jnp.float32), jnp.diag(t_l))
          + jnp.kron(jnp.eye(Wh, k=-1, dtype=jnp.float32), jnp.diag(t_r)))
    aux = jnp.stack([jnp.tile(t_u, Wh), jnp.tile(t_d, Wh), jnp.tile(bn_sh, Wh)])
    w_bd = jnp.kron(eye0, p['pw_w'].T)                 # block-diagonal 1x1 pw conv
    return dict(th=th.astype(mm_dtype),
                aux=aux.astype(jnp.float32),           # VPU math stays f32 (v5e-safe)
                w_bd=w_bd.astype(mm_dtype))


# ----------------------------------------------------------------------------
# Pallas wrapper
# ----------------------------------------------------------------------------
def decoder_block_v1_pallas(x_nhwc, x0_nhwc, raw, *, shortcut,
                            mm_dtype=jnp.bfloat16):
    B, H, W, C0 = x_nhwc.shape
    B0, Hh, Wh, C0b = x0_nhwc.shape
    assert B0 == B and Hh == 2 * H and Wh == 2 * W and C0b == C0
    Cin = 2 * C0
    Cout = raw['cb_c']['pw_w'].shape[0]

    # At most two "parallel" grid steps over the batch: keeps both v7x TCs busy while
    # avoiding per-step pipeline overhead (the kernel is overhead-bound at this size).
    G = 2 if (B % 2 == 0 and B >= 2 and ((B // 2) * H) % 8 == 0) else 1
    Bb = B // G
    R = Bb * Hh                                   # rows handled per grid step

    # ---- constant geometry matrices (baked in at trace time) --------------------
    u_h = np.kron(np.eye(Bb, dtype=np.float32), _upsample_matrix(H))   # (R, Bb*H)
    u_w = _upsample_matrix(W)                                          # (Wh, W)
    m_w = np.kron(u_w.T, np.eye(C0, dtype=np.float32))                 # (W*C0, Wh*C0)
    s_up = np.concatenate([np.eye(C0, dtype=np.float32),
                           np.zeros((C0, C0), np.float32)], axis=1)    # up -> ch [0,C0)
    s_x0 = np.concatenate([np.zeros((C0, C0), np.float32),
                           np.eye(C0, dtype=np.float32)], axis=1)      # x0 -> ch [C0,2C0)
    m_x = m_w @ np.kron(np.eye(Wh, dtype=np.float32), s_up)            # (W*C0, Wh*Cin)
    m_x0 = np.kron(np.eye(Wh, dtype=np.float32), s_x0)                 # (Wh*C0, Wh*Cin)
    rr = np.arange(R)
    hh = rr % Hh
    sup = np.zeros((R, R), np.float32)
    sup[rr[hh > 0], rr[hh > 0] - 1] = 1.0           # row h reads h-1 within each image
    sdn = np.zeros((R, R), np.float32)
    sdn[rr[hh < Hh - 1], rr[hh < Hh - 1] + 1] = 1.0

    geom = [jnp.asarray(a, mm_dtype) for a in (u_h, m_x, m_x0, sup, sdn)]

    # ---- fold BN + depthwise taps + pw weights into lane-packed matrices --------
    pkA = _pack_convblock(raw['cb_a'], Wh, mm_dtype)    # Cin    -> Cin//4
    pkB = _pack_convblock(raw['cb_b'], Wh, mm_dtype)    # Cin//4 -> Cin
    pkC = _pack_convblock(raw['cb_c'], Wh, mm_dtype)    # Cin    -> Cout
    blocks = [pkA['th'], pkA['aux'], pkA['w_bd'],
              pkB['th'], pkB['aux'], pkB['w_bd'],
              pkC['th'], pkC['aux'], pkC['w_bd']]
    consts = geom + blocks

    # ---- lane-packed 2-D views of the inputs / output (free, contiguous) --------
    x2 = x_nhwc.reshape(B * H, W * C0)
    x02 = x0_nhwc.reshape(B * Hh, Wh * C0)

    def data_spec(rows, cols):
        return pl.BlockSpec((rows, cols), lambda i: (i, 0))

    def const_spec(a):
        return pl.BlockSpec(a.shape, lambda i: (0, 0))

    in_specs = ([data_spec(Bb * H, W * C0), data_spec(R, Wh * C0)]
                + [const_spec(a) for a in consts])
    out_spec = data_spec(R, Wh * Cout)

    grid_spec = pltpu.PrefetchScalarGridSpec(
        num_scalar_prefetch=0,
        grid=(G,),
        in_specs=in_specs,
        out_specs=out_spec)

    # Advisory cost estimate for the XLA scheduler.
    L1, L4, Lo = Wh * Cin, Wh * (Cin // 4), Wh * Cout

    def blk_flops(lin, lout):
        return 2 * R * lin * lin + 4 * R * R * lin + 2 * R * lin * lout

    flops = G * (2 * R * (Bb * H) * (W * C0)
                 + 2 * R * (W * C0) * L1 + 2 * R * (Wh * C0) * L1
                 + blk_flops(L1, L4) + blk_flops(L4, L1) + blk_flops(L1, Lo))
    bytes_acc = 4 * (int(x2.size) + int(x02.size) + B * Hh * Wh * Cout) + int(
        sum(int(a.size) * a.dtype.itemsize for a in consts))

    fn = pl.pallas_call(
        functools.partial(_decoder_kernel, shortcut=shortcut, mm_dtype=mm_dtype),
        out_shape=jax.ShapeDtypeStruct((B * Hh, Wh * Cout), jnp.float32),
        grid_spec=grid_spec,
        compiler_params=pltpu.CompilerParams(dimension_semantics=("parallel",)),
        cost_estimate=pl.CostEstimate(flops=int(flops), transcendentals=0,
                                      bytes_accessed=int(bytes_acc)),
    )
    out2d = fn(x2, x02, *consts)
    return out2d.reshape(B, Hh, Wh, Cout)


# ----------------------------------------------------------------------------
# Deterministic parameter init (PyTorch module shapes)
# ----------------------------------------------------------------------------
def _init_convblock(key, cin, cout, eps=1e-5):
    ks = jax.random.split(key, 8)

    def nrm(k, shape, s=0.3):
        return s * jax.random.normal(k, shape, dtype=jnp.float32)

    dw_w = nrm(ks[0], (cin,))                   # dw_conv.weight  (cin,1,1,1)
    hori_w = nrm(ks[1], (cin, 3))               # hori_conv.weight (cin,1,1,3)
    vert_w = nrm(ks[2], (cin, 3))               # vert_conv.weight (cin,1,3,1)
    gamma = 1.0 + nrm(ks[3], (cin,), 0.1)
    beta = nrm(ks[4], (cin,), 0.1)
    mean = nrm(ks[5], (cin,), 0.1)
    var = jax.random.uniform(ks[6], (cin,), jnp.float32, 0.5, 1.5)
    pw_w = nrm(ks[7], (cout, cin))              # pw_conv.weight  (cout,cin,1,1)

    bn_s = gamma / jnp.sqrt(var + eps)          # eval-mode BN folded to affine
    bn_sh = beta - mean * bn_s
    return dict(dw_w=dw_w, hori_w=hori_w, vert_w=vert_w,
                bn_s=bn_s, bn_sh=bn_sh, pw_w=pw_w)


def init_params(key, in_channels, out_channels):
    cin = 2 * in_channels
    ka, kb, kc = jax.random.split(key, 3)
    return dict(cb_a=_init_convblock(ka, cin, cin // 4),
                cb_b=_init_convblock(kb, cin // 4, cin),
                cb_c=_init_convblock(kc, cin, out_channels))


# ----------------------------------------------------------------------------
# Pure-JAX reference (eval-mode BN), for correctness check
# ----------------------------------------------------------------------------
def _upsample_axis_2x(t, axis):
    n = t.shape[axis]
    first = lax.slice_in_dim(t, 0, 1, axis=axis)
    last = lax.slice_in_dim(t, n - 1, n, axis=axis)
    prev = jnp.concatenate([first, lax.slice_in_dim(t, 0, n - 1, axis=axis)], axis=axis)
    nxt = jnp.concatenate([lax.slice_in_dim(t, 1, n, axis=axis), last], axis=axis)
    even = 0.25 * prev + 0.75 * t        # out[2k]   = .25*in[k-1] + .75*in[k]
    odd = 0.75 * t + 0.25 * nxt          # out[2k+1] = .75*in[k]   + .25*in[k+1]
    out = jnp.stack([even, odd], axis=axis + 1)
    shape = list(t.shape)
    shape[axis] = 2 * n
    return out.reshape(shape)


def bilinear_upsample_2x(x_nhwc):
    return _upsample_axis_2x(_upsample_axis_2x(x_nhwc, 1), 2)


def _conv_block_ref(x, p):
    C = x.shape[-1]
    hp = lax.Precision.HIGHEST
    x0 = x * p['dw_w']
    wh = p['hori_w'].T[None, :, None, :]                  # (1,3,1,C)
    x1 = lax.conv_general_dilated(x, wh, (1, 1), [(0, 0), (1, 1)],
                                  dimension_numbers=('NHWC', 'HWIO', 'NHWC'),
                                  feature_group_count=C, precision=hp)
    wv = p['vert_w'].T[:, None, None, :]                  # (3,1,1,C)
    x2 = lax.conv_general_dilated(x, wv, (1, 1), [(1, 1), (0, 0)],
                                  dimension_numbers=('NHWC', 'HWIO', 'NHWC'),
                                  feature_group_count=C, precision=hp)
    s = x1 + x2 + x0
    s = jax.nn.relu(s * p['bn_s'] + p['bn_sh'])
    y = jnp.einsum('bhwc,oc->bhwo', s, p['pw_w'], precision=hp)
    return jax.nn.relu(y)


def decoder_block_v1_ref(x_nhwc, x0_nhwc, raw, *, shortcut):
    cat = jnp.concatenate([bilinear_upsample_2x(x_nhwc), x0_nhwc], axis=-1)
    m = _conv_block_ref(_conv_block_ref(cat, raw['cb_a']), raw['cb_b'])
    h = m + cat if shortcut else m
    return _conv_block_ref(h, raw['cb_c'])


if __name__ == "__main__":
    B, in_ch, out_ch, H, W = 2, 4, 8, 8, 8
    root = jax.random.PRNGKey(0)
    kx, kx0, kp = jax.random.split(root, 3)

    # PyTorch NCHW inputs: x (low-res), x0 (skip connection at 2x resolution)
    x_nchw = jax.random.normal(kx, (B, in_ch, H, W), dtype=jnp.float32)
    x0_nchw = jax.random.normal(kx0, (B, in_ch, 2 * H, 2 * W), dtype=jnp.float32)
    x_nhwc = jnp.transpose(x_nchw, (0, 2, 3, 1))
    x0_nhwc = jnp.transpose(x0_nchw, (0, 2, 3, 1))

    raw = init_params(kp, in_ch, out_ch)
    shortcut = (2 * in_ch == out_ch)        # C2f: shortcut and in_channels == out_channels

    ref_nhwc = decoder_block_v1_ref(x_nhwc, x0_nhwc, raw, shortcut=shortcut)

    # 1) float32 MXU-operand run: tight check of the packed-matrix / stencil math.
    out_f32 = decoder_block_v1_pallas(x_nhwc, x0_nhwc, raw, shortcut=shortcut,
                                      mm_dtype=jnp.float32)
    out_f32 = jax.block_until_ready(out_f32)
    np.testing.assert_allclose(np.asarray(out_f32), np.asarray(ref_nhwc),
                               rtol=1e-3, atol=1e-3)

    # 2) default bfloat16 MXU-operand run (full-rate MXU on v5e/v6e/v7x).  Looser
    #    tolerance: bf16 operand rounding accumulates across 3 chained ConvBlocks.
    out_bf16 = decoder_block_v1_pallas(x_nhwc, x0_nhwc, raw, shortcut=shortcut,
                                       mm_dtype=jnp.bfloat16)
    out_bf16 = jax.block_until_ready(out_bf16)
    np.testing.assert_allclose(np.asarray(out_bf16), np.asarray(ref_nhwc),
                               rtol=1.5e-1, atol=1.5e-1)

    out_nchw = jnp.transpose(out_bf16, (0, 3, 1, 2))
    assert out_nchw.shape == (B, out_ch, 2 * H, 2 * W)
    print("KERNEL_OK")
</pallas_src>

<mosaic_0001>
module attributes {stable_mosaic.version = 11 : i64} {
  func.func @_decoder_kernel(%arg0: i32, %arg1: memref<8x32xf32, #tpu.memory_space<vmem>>, %arg2: memref<16x64xf32, #tpu.memory_space<vmem>>, %arg3: memref<16x8xf32, #tpu.memory_space<vmem>>, %arg4: memref<32x128xf32, #tpu.memory_space<vmem>>, %arg5: memref<64x128xf32, #tpu.memory_space<vmem>>, %arg6: memref<16x16xf32, #tpu.memory_space<vmem>>, %arg7: memref<16x16xf32, #tpu.memory_space<vmem>>, %arg8: memref<128x128xf32, #tpu.memory_space<vmem>>, %arg9: memref<3x128xf32, #tpu.memory_space<vmem>>, %arg10: memref<128x32xf32, #tpu.memory_space<vmem>>, %arg11: memref<32x32xf32, #tpu.memory_space<vmem>>, %arg12: memref<3x32xf32, #tpu.memory_space<vmem>>, %arg13: memref<32x128xf32, #tpu.memory_space<vmem>>, %arg14: memref<128x128xf32, #tpu.memory_space<vmem>>, %arg15: memref<3x128xf32, #tpu.memory_space<vmem>>, %arg16: memref<128x128xf32, #tpu.memory_space<vmem>>, %arg17: memref<16x128xf32, #tpu.memory_space<vmem>>) attributes {dimension_semantics = [#tpu.dimension_semantics<parallel>], iteration_bounds = array<i64: 2>, scalar_prefetch = 0 : i64, scratch_operands = 0 : i64, tpu.core_type = #tpu.core_type<tc>, window_params = [{transform_indices = @transform_0, window_bounds = array<i64: 8, 32>}, {transform_indices = @transform_1, window_bounds = array<i64: 16, 64>}, {pipeline_mode = #tpu.pipeline_mode<synchronous>, transform_indices = @transform_2, window_bounds = array<i64: 16, 8>}, {pipeline_mode = #tpu.pipeline_mode<synchronous>, transform_indices = @transform_3, window_bounds = array<i64: 32, 128>}, {pipeline_mode = #tpu.pipeline_mode<synchronous>, transform_indices = @transform_4, window_bounds = array<i64: 64, 128>}, {pipeline_mode = #tpu.pipeline_mode<synchronous>, transform_indices = @transform_5, window_bounds = array<i64: 16, 16>}, {pipeline_mode = #tpu.pipeline_mode<synchronous>, transform_indices = @transform_6, window_bounds = array<i64: 16, 16>}, {pipeline_mode = #tpu.pipeline_mode<synchronous>, transform_indices = @transform_7, window_bounds = array<i64: 128, 128>}, {pipeline_mode = #tpu.pipeline_mode<synchronous>, transform_indices = @transform_8, window_bounds = array<i64: 3, 128>}, {pipeline_mode = #tpu.pipeline_mode<synchronous>, transform_indices = @transform_9, window_bounds = array<i64: 128, 32>}, {pipeline_mode = #tpu.pipeline_mode<synchronous>, transform_indices = @transform_10, window_bounds = array<i64: 32, 32>}, {pipeline_mode = #tpu.pipeline_mode<synchronous>, transform_indices = @transform_11, window_bounds = array<i64: 3, 32>}, {pipeline_mode = #tpu.pipeline_mode<synchronous>, transform_indices = @transform_12, window_bounds = array<i64: 32, 128>}, {pipeline_mode = #tpu.pipeline_mode<synchronous>, transform_indices = @transform_13, window_bounds = array<i64: 128, 128>}, {pipeline_mode = #tpu.pipeline_mode<synchronous>, transform_indices = @transform_14, window_bounds = array<i64: 3, 128>}, {pipeline_mode = #tpu.pipeline_mode<synchronous>, transform_indices = @transform_15, window_bounds = array<i64: 128, 128>}, {transform_indices = @transform_16, window_bounds = array<i64: 16, 128>}]} {
    %c0 = arith.constant 0 : index
    %c0_0 = arith.constant 0 : index
    %0 = vector.load %arg6[%c0, %c0_0] : memref<16x16xf32, #tpu.memory_space<vmem>>, vector<16x16xf32>
    %c0_1 = arith.constant 0 : index
    %c0_2 = arith.constant 0 : index
    %1 = vector.load %arg7[%c0_1, %c0_2] : memref<16x16xf32, #tpu.memory_space<vmem>>, vector<16x16xf32>
    %c0_3 = arith.constant 0 : index
    %c0_4 = arith.constant 0 : index
    %2 = vector.load %arg1[%c0_3, %c0_4] : memref<8x32xf32, #tpu.memory_space<vmem>>, vector<8x32xf32>
    %c0_5 = arith.constant 0 : index
    %c0_6 = arith.constant 0 : index
    %3 = vector.load %arg2[%c0_5, %c0_6] : memref<16x64xf32, #tpu.memory_space<vmem>>, vector<16x64xf32>
    %c0_7 = arith.constant 0 : index
    %c0_8 = arith.constant 0 : index
    %4 = vector.load %arg3[%c0_7, %c0_8] : memref<16x8xf32, #tpu.memory_space<vmem>>, vector<16x8xf32>
    %cst = arith.constant dense<0.000000e+00> : vector<16x32xf32>
    %5 = tpu.matmul %4, %2, %cst {dimension_numbers = #tpu.dot_dimension_numbers<[1], [0], [0], [1], [0, 0, 1, 1], [], []>} : vector<16x8xf32>, vector<8x32xf32>, vector<16x32xf32> -> vector<16x32xf32>
    %c0_9 = arith.constant 0 : index
    %c0_10 = arith.constant 0 : index
    %6 = vector.load %arg4[%c0_9, %c0_10] : memref<32x128xf32, #tpu.memory_space<vmem>>, vector<32x128xf32>
    %cst_11 = arith.constant dense<0.000000e+00> : vector<16x128xf32>
    %7 = tpu.matmul %5, %6, %cst_11 {dimension_numbers = #tpu.dot_dimension_numbers<[1], [0], [0], [1], [0, 0, 1, 1], [], []>} : vector<16x32xf32>, vector<32x128xf32>, vector<16x128xf32> -> vector<16x128xf32>
    %c0_12 = arith.constant 0 : index
    %c0_13 = arith.constant 0 : index
    %8 = vector.load %arg5[%c0_12, %c0_13] : memref<64x128xf32, #tpu.memory_space<vmem>>, vector<64x128xf32>
    %cst_14 = arith.constant dense<0.000000e+00> : vector<16x128xf32>
    %9 = tpu.matmul %3, %8, %cst_14 {dimension_numbers = #tpu.dot_dimension_numbers<[1], [0], [0], [1], [0, 0, 1, 1], [], []>} : vector<16x64xf32>, vector<64x128xf32>, vector<16x128xf32> -> vector<16x128xf32>
    %10 = arith.addf %7, %9 : vector<16x128xf32>
    %c0_15 = arith.constant 0 : index
    %c0_16 = arith.constant 0 : index
    %11 = vector.load %arg9[%c0_15, %c0_16] : memref<3x128xf32, #tpu.memory_space<vmem>>, vector<3x128xf32>
    %c0_17 = arith.constant 0 : index
    %c0_18 = arith.constant 0 : index
    %12 = vector.load %arg8[%c0_17, %c0_18] : memref<128x128xf32, #tpu.memory_space<vmem>>, vector<128x128xf32>
    %cst_19 = arith.constant dense<0.000000e+00> : vector<16x128xf32>
    %13 = tpu.matmul %10, %12, %cst_19 {dimension_numbers = #tpu.dot_dimension_numbers<[1], [0], [0], [1], [0, 0, 1, 1], [], []>} : vector<16x128xf32>, vector<128x128xf32>, vector<16x128xf32> -> vector<16x128xf32>
    %14 = vector.extract_strided_slice %11 {offsets = [0, 0], sizes = [1, 128], strides = [1, 1]} : vector<3x128xf32> to vector<1x128xf32>
    %15 = vector.broadcast %14 : vector<1x128xf32> to vector<16x128xf32>
    %16 = arith.mulf %10, %15 : vector<16x128xf32>
    %cst_20 = arith.constant dense<0.000000e+00> : vector<16x128xf32>
    %17 = tpu.matmul %0, %16, %cst_20 {dimension_numbers = #tpu.dot_dimension_numbers<[1], [0], [0], [1], [0, 0, 1, 1], [], []>} : vector<16x16xf32>, vector<16x128xf32>, vector<16x128xf32> -> vector<16x128xf32>
    %18 = arith.addf %13, %17 : vector<16x128xf32>
    %19 = vector.extract_strided_slice %11 {offsets = [1, 0], sizes = [1, 128], strides = [1, 1]} : vector<3x128xf32> to vector<1x128xf32>
    %20 = vector.broadcast %19 : vector<1x128xf32> to vector<16x128xf32>
    %21 = arith.mulf %10, %20 : vector<16x128xf32>
    %cst_21 = arith.constant dense<0.000000e+00> : vector<16x128xf32>
    %22 = tpu.matmul %1, %21, %cst_21 {dimension_numbers = #tpu.dot_dimension_numbers<[1], [0], [0], [1], [0, 0, 1, 1], [], []>} : vector<16x16xf32>, vector<16x128xf32>, vector<16x128xf32> -> vector<16x128xf32>
    %23 = arith.addf %18, %22 : vector<16x128xf32>
    %24 = vector.extract_strided_slice %11 {offsets = [2, 0], sizes = [1, 128], strides = [1, 1]} : vector<3x128xf32> to vector<1x128xf32>
    %25 = vector.broadcast %24 : vector<1x128xf32> to vector<16x128xf32>
    %26 = arith.addf %23, %25 : vector<16x128xf32>
    %cst_22 = arith.constant 0.000000e+00 : f32
    %27 = vector.broadcast %cst_22 : f32 to vector<16x128xf32>
    %28 = arith.maximumf %26, %27 : vector<16x128xf32>
    %c0_23 = arith.constant 0 : index
    %c0_24 = arith.constant 0 : index
    %29 = vector.load %arg10[%c0_23, %c0_24] : memref<128x32xf32, #tpu.memory_space<vmem>>, vector<128x32xf32>
    %cst_25 = arith.constant dense<0.000000e+00> : vector<16x32xf32>
    %30 = tpu.matmul %28, %29, %cst_25 {dimension_numbers = #tpu.dot_dimension_numbers<[1], [0], [0], [1], [0, 0, 1, 1], [], []>} : vector<16x128xf32>, vector<128x32xf32>, vector<16x32xf32> -> vector<16x32xf32>
    %cst_26 = arith.constant 0.000000e+00 : f32
    %31 = vector.broadcast %cst_26 : f32 to vector<16x32xf32>
    %32 = arith.maximumf %30, %31 : vector<16x32xf32>
    %c0_27 = arith.constant 0 : index
    %c0_28 = arith.constant 0 : index
    %33 = vector.load %arg12[%c0_27, %c0_28] : memref<3x32xf32, #tpu.memory_space<vmem>>, vector<3x32xf32>
    %c0_29 = arith.constant 0 : index
    %c0_30 = arith.constant 0 : index
    %34 = vector.load %arg11[%c0_29, %c0_30] : memref<32x32xf32, #tpu.memory_space<vmem>>, vector<32x32xf32>
    %cst_31 = arith.constant dense<0.000000e+00> : vector<16x32xf32>
    %35 = tpu.matmul %32, %34, %cst_31 {dimension_numbers = #tpu.dot_dimension_numbers<[1], [0], [0], [1], [0, 0, 1, 1], [], []>} : vector<16x32xf32>, vector<32x32xf32>, vector<16x32xf32> -> vector<16x32xf32>
    %36 = vector.extract_strided_slice %33 {offsets = [0, 0], sizes = [1, 32], strides = [1, 1]} : vector<3x32xf32> to vector<1x32xf32>
    %37 = vector.broadcast %36 : vector<1x32xf32> to vector<16x32xf32>
    %38 = arith.mulf %32, %37 : vector<16x32xf32>
    %cst_32 = arith.constant dense<0.000000e+00> : vector<16x32xf32>
    %39 = tpu.matmul %0, %38, %cst_32 {dimension_numbers = #tpu.dot_dimension_numbers<[1], [0], [0], [1], [0, 0, 1, 1], [], []>} : vector<16x16xf32>, vector<16x32xf32>, vector<16x32xf32> -> vector<16x32xf32>
    %40 = arith.addf %35, %39 : vector<16x32xf32>
    %41 = vector.extract_strided_slice %33 {offsets = [1, 0], sizes = [1, 32], strides = [1, 1]} : vector<3x32xf32> to vector<1x32xf32>
    %42 = vector.broadcast %41 : vector<1x32xf32> to vector<16x32xf32>
    %43 = arith.mulf %32, %42 : vector<16x32xf32>
    %cst_33 = arith.constant dense<0.000000e+00> : vector<16x32xf32>
    %44 = tpu.matmul %1, %43, %cst_33 {dimension_numbers = #tpu.dot_dimension_numbers<[1], [0], [0], [1], [0, 0, 1, 1], [], []>} : vector<16x16xf32>, vector<16x32xf32>, vector<16x32xf32> -> vector<16x32xf32>
    %45 = arith.addf %40, %44 : vector<16x32xf32>
    %46 = vector.extract_strided_slice %33 {offsets = [2, 0], sizes = [1, 32], strides = [1, 1]} : vector<3x32xf32> to vector<1x32xf32>
    %47 = vector.broadcast %46 : vector<1x32xf32> to vector<16x32xf32>
    %48 = arith.addf %45, %47 : vector<16x32xf32>
    %cst_34 = arith.constant 0.000000e+00 : f32
    %49 = vector.broadcast %cst_34 : f32 to vector<16x32xf32>
    %50 = arith.maximumf %48, %49 : vector<16x32xf32>
    %c0_35 = arith.constant 0 : index
    %c0_36 = arith.constant 0 : index
    %51 = vector.load %arg13[%c0_35, %c0_36] : memref<32x128xf32, #tpu.memory_space<vmem>>, vector<32x128xf32>
    %cst_37 = arith.constant dense<0.000000e+00> : vector<16x128xf32>
    %52 = tpu.matmul %50, %51, %cst_37 {dimension_numbers = #tpu.dot_dimension_numbers<[1], [0], [0], [1], [0, 0, 1, 1], [], []>} : vector<16x32xf32>, vector<32x128xf32>, vector<16x128xf32> -> vector<16x128xf32>
    %cst_38 = arith.constant 0.000000e+00 : f32
    %53 = vector.broadcast %cst_38 : f32 to vector<16x128xf32>
    %54 = arith.maximumf %52, %53 : vector<16x128xf32>
    %55 = arith.addf %54, %10 : vector<16x128xf32>
    %c0_39 = arith.constant 0 : index
    %c0_40 = arith.constant 0 : index
    %56 = vector.load %arg15[%c0_39, %c0_40] : memref<3x128xf32, #tpu.memory_space<vmem>>, vector<3x128xf32>
    %c0_41 = arith.constant 0 : index
    %c0_42 = arith.constant 0 : index
    %57 = vector.load %arg14[%c0_41, %c0_42] : memref<128x128xf32, #tpu.memory_space<vmem>>, vector<128x128xf32>
    %cst_43 = arith.constant dense<0.000000e+00> : vector<16x128xf32>
    %58 = tpu.matmul %55, %57, %cst_43 {dimension_numbers = #tpu.dot_dimension_numbers<[1], [0], [0], [1], [0, 0, 1, 1], [], []>} : vector<16x128xf32>, vector<128x128xf32>, vector<16x128xf32> -> vector<16x128xf32>
    %59 = vector.extract_strided_slice %56 {offsets = [0, 0], sizes = [1, 128], strides = [1, 1]} : vector<3x128xf32> to vector<1x128xf32>
    %60 = vector.broadcast %59 : vector<1x128xf32> to vector<16x128xf32>
    %61 = arith.mulf %55, %60 : vector<16x128xf32>
    %cst_44 = arith.constant dense<0.000000e+00> : vector<16x128xf32>
    %62 = tpu.matmul %0, %61, %cst_44 {dimension_numbers = #tpu.dot_dimension_numbers<[1], [0], [0], [1], [0, 0, 1, 1], [], []>} : vector<16x16xf32>, vector<16x128xf32>, vector<16x128xf32> -> vector<16x128xf32>
    %63 = arith.addf %58, %62 : vector<16x128xf32>
    %64 = vector.extract_strided_slice %56 {offsets = [1, 0], sizes = [1, 128], strides = [1, 1]} : vector<3x128xf32> to vector<1x128xf32>
    %65 = vector.broadcast %64 : vector<1x128xf32> to vector<16x128xf32>
    %66 = arith.mulf %55, %65 : vector<16x128xf32>
    %cst_45 = arith.constant dense<0.000000e+00> : vector<16x128xf32>
    %67 = tpu.matmul %1, %66, %cst_45 {dimension_numbers = #tpu.dot_dimension_numbers<[1], [0], [0], [1], [0, 0, 1, 1], [], []>} : vector<16x16xf32>, vector<16x128xf32>, vector<16x128xf32> -> vector<16x128xf32>
    %68 = arith.addf %63, %67 : vector<16x128xf32>
    %69 = vector.extract_strided_slice %56 {offsets = [2, 0], sizes = [1, 128], strides = [1, 1]} : vector<3x128xf32> to vector<1x128xf32>
    %70 = vector.broadcast %69 : vector<1x128xf32> to vector<16x128xf32>
    %71 = arith.addf %68, %70 : vector<16x128xf32>
    %cst_46 = arith.constant 0.000000e+00 : f32
    %72 = vector.broadcast %cst_46 : f32 to vector<16x128xf32>
    %73 = arith.maximumf %71, %72 : vector<16x128xf32>
    %c0_47 = arith.constant 0 : index
    %c0_48 = arith.constant 0 : index
    %74 = vector.load %arg16[%c0_47, %c0_48] : memref<128x128xf32, #tpu.memory_space<vmem>>, vector<128x128xf32>
    %cst_49 = arith.constant dense<0.000000e+00> : vector<16x128xf32>
    %75 = tpu.matmul %73, %74, %cst_49 {dimension_numbers = #tpu.dot_dimension_numbers<[1], [0], [0], [1], [0, 0, 1, 1], [], []>} : vector<16x128xf32>, vector<128x128xf32>, vector<16x128xf32> -> vector<16x128xf32>
    %cst_50 = arith.constant 0.000000e+00 : f32
    %76 = vector.broadcast %cst_50 : f32 to vector<16x128xf32>
    %77 = arith.maximumf %75, %76 : vector<16x128xf32>
    %c0_51 = arith.constant 0 : index
    %c0_52 = arith.constant 0 : index
    %78 = vector.load %arg17[%c0_51, %c0_52] : memref<16x128xf32, #tpu.memory_space<vmem>>, vector<16x128xf32>
    tpu.vector_store %arg17[%c0_51, %c0_52], %77 {strides = array<i32>} : memref<16x128xf32, #tpu.memory_space<vmem>>, vector<16x128xf32>,
    return
  }
  func.func @transform_0(%arg0: i32) -> (i32, i32) {
    %c0_i32 = arith.constant 0 : i32
    %c0_i32_0 = arith.constant 0 : i32
    return %arg0, %c0_i32 : i32, i32
  }
  func.func @transform_1(%arg0: i32) -> (i32, i32) {
    %c0_i32 = arith.constant 0 : i32
    %c0_i32_0 = arith.constant 0 : i32
    return %arg0, %c0_i32 : i32, i32
  }
  func.func @transform_2(%arg0: i32) -> (i32, i32) {
    %c0_i32 = arith.constant 0 : i32
    %c0_i32_0 = arith.constant 0 : i32
    %c0_i32_1 = arith.constant 0 : i32
    return %c0_i32, %c0_i32_0 : i32, i32
  }
  func.func @transform_3(%arg0: i32) -> (i32, i32) {
    %c0_i32 = arith.constant 0 : i32
    %c0_i32_0 = arith.constant 0 : i32
    %c0_i32_1 = arith.constant 0 : i32
    return %c0_i32, %c0_i32_0 : i32, i32
  }
  func.func @transform_4(%arg0: i32) -> (i32, i32) {
    %c0_i32 = arith.constant 0 : i32
    %c0_i32_0 = arith.constant 0 : i32
    %c0_i32_1 = arith.constant 0 : i32
    return %c0_i32, %c0_i32_0 : i32, i32
  }
  func.func @transform_5(%arg0: i32) -> (i32, i32) {
    %c0_i32 = arith.constant 0 : i32
    %c0_i32_0 = arith.constant 0 : i32
    %c0_i32_1 = arith.constant 0 : i32
    return %c0_i32, %c0_i32_0 : i32, i32
  }
  func.func @transform_6(%arg0: i32) -> (i32, i32) {
    %c0_i32 = arith.constant 0 : i32
    %c0_i32_0 = arith.constant 0 : i32
    %c0_i32_1 = arith.constant 0 : i32
    return %c0_i32, %c0_i32_0 : i32, i32
  }
  func.func @transform_7(%arg0: i32) -> (i32, i32) {
    %c0_i32 = arith.constant 0 : i32
    %c0_i32_0 = arith.constant 0 : i32
    %c0_i32_1 = arith.constant 0 : i32
    return %c0_i32, %c0_i32_0 : i32, i32
  }
  func.func @transform_8(%arg0: i32) -> (i32, i32) {
    %c0_i32 = arith.constant 0 : i32
    %c0_i32_0 = arith.constant 0 : i32
    %c0_i32_1 = arith.constant 0 : i32
    return %c0_i32, %c0_i32_0 : i32, i32
  }
  func.func @transform_9(%arg0: i32) -> (i32, i32) {
    %c0_i32 = arith.constant 0 : i32
    %c0_i32_0 = arith.constant 0 : i32
    %c0_i32_1 = arith.constant 0 : i32
    return %c0_i32, %c0_i32_0 : i32, i32
  }
  func.func @transform_10(%arg0: i32) -> (i32, i32) {
    %c0_i32 = arith.constant 0 : i32
    %c0_i32_0 = arith.constant 0 : i32
    %c0_i32_1 = arith.constant 0 : i32
    return %c0_i32, %c0_i32_0 : i32, i32
  }
  func.func @transform_11(%arg0: i32) -> (i32, i32) {
    %c0_i32 = arith.constant 0 : i32
    %c0_i32_0 = arith.constant 0 : i32
    %c0_i32_1 = arith.constant 0 : i32
    return %c0_i32, %c0_i32_0 : i32, i32
  }
  func.func @transform_12(%arg0: i32) -> (i32, i32) {
    %c0_i32 = arith.constant 0 : i32
    %c0_i32_0 = arith.constant 0 : i32
    %c0_i32_1 = arith.constant 0 : i32
    return %c0_i32, %c0_i32_0 : i32, i32
  }
  func.func @transform_13(%arg0: i32) -> (i32, i32) {
    %c0_i32 = arith.constant 0 : i32
    %c0_i32_0 = arith.constant 0 : i32
    %c0_i32_1 = arith.constant 0 : i32
    return %c0_i32, %c0_i32_0 : i32, i32
  }
  func.func @transform_14(%arg0: i32) -> (i32, i32) {
    %c0_i32 = arith.constant 0 : i32
    %c0_i32_0 = arith.constant 0 : i32
    %c0_i32_1 = arith.constant 0 : i32
    return %c0_i32, %c0_i32_0 : i32, i32
  }
  func.func @transform_15(%arg0: i32) -> (i32, i32) {
    %c0_i32 = arith.constant 0 : i32
    %c0_i32_0 = arith.constant 0 : i32
    %c0_i32_1 = arith.constant 0 : i32
    return %c0_i32, %c0_i32_0 : i32, i32
  }
  func.func @transform_16(%arg0: i32) -> (i32, i32) {
    %c0_i32 = arith.constant 0 : i32
    %c0_i32_0 = arith.constant 0 : i32
    return %arg0, %c0_i32 : i32, i32
  }
}

</mosaic_0001>

<bundles_post_ra>
// kernel: tpu_custom_call.1
= control target key start
LH: loop header
LB: loop body
LE: loop exit
PB: predicated region body
PF: predicated region fallthrough
CT: control target
= control target key end

     0   :  { %s3709_s0 = inlined_call_operand.hbm [shape: f32[16,32], index: 0, kind: input, shape index: {}]   ;;  %s3710_s1 = inlined_call_operand.hbm [shape: f32[32,64], index: 1, kind: input, shape index: {}]   ;;  %s3711_s2 = inlined_call_operand.vmem [shape: f32[16,8], index: 2, kind: input, shape index: {}]   ;;  %s3712_s3 = inlined_call_operand.hbm [shape: f32[32,128], index: 3, kind: input, shape index: {}]   ;;  %s3713_s4 = inlined_call_operand.vmem [shape: f32[64,128], index: 4, kind: input, shape index: {}]   ;;  %s3714_s5 = inlined_call_operand.hbm [shape: f32[16,16], index: 5, kind: input, shape index: {}]   ;;  %s3715_s6 = inlined_call_operand.hbm [shape: f32[16,16], index: 6, kind: input, shape index: {}]   ;;  %s3716_s7 = inlined_call_operand.vmem [shape: f32[128,128], index: 7, kind: input, shape index: {}]   ;;  %s3717_s8 = inlined_call_operand.vmem [shape: f32[3,128], index: 8, kind: input, shape index: {}]   ;;  %s3718_s9 = inlined_call_operand.vmem [shape: f32[128,32], index: 9, kind: input, shape index: {}]   ;;  %s3719_s10 = inlined_call_operand.hbm [shape: f32[32,32], index: 10, kind: input, shape index: {}]   ;;  %s3720_s11 = inlined_call_operand.vmem [shape: f32[3,32], index: 11, kind: input, shape index: {}]   ;;  %s3721_s12 = inlined_call_operand.hbm [shape: f32[32,128], index: 12, kind: input, shape index: {}]   ;;  %s3722_s13 = inlined_call_operand.hbm [shape: f32[128,128], index: 13, kind: input, shape index: {}]   ;;  %s3723_s14 = inlined_call_operand.vmem [shape: f32[3,128], index: 14, kind: input, shape index: {}]   ;;  %s3724_s15 = inlined_call_operand.hbm [shape: f32[128,128], index: 15, kind: input, shape index: {}]   ;;  %s3725_s16 = inlined_call_operand.hbm [shape: f32[32,128], index: 16, kind: output, shape index: {}]  }
   0x1   :  { %3735 = sst [smem:[#allocation27_spill]] %s3709_s0 }
   0x2   :  { %3736 = sst [smem:[#allocation28_spill]] %s3712_s3 }
   0x3   :  { %3737 = sst [smem:[#allocation29_spill]] %s3714_s5 }
   0x4   :  { %3738 = sst [smem:[#allocation30_spill]] %s3715_s6 }
   0x5   :  { %3739 = sst [smem:[#allocation31_spill]] %s3719_s10 }
   0x6   :  { %3740 = sst [smem:[#allocation32_spill]] %s3721_s12 }
   0x7   :  { %3741 = sst [smem:[#allocation33_spill]] %s3722_s13 }
   0x8   :  { %3742 = sst [smem:[#allocation34_spill]] %s3723_s14 }
   0x9   :  { %3743 = sst [smem:[#allocation35_spill]] %s3724_s15 }
   0xa   :  { %3744 = sst [smem:[#allocation36_spill]] %s3725_s16 }
   0xb   :  { %21 = vsyncpa [#allocation3], 0 }
   0xc   :  { %23 = vsyncpa [#allocation3 + $0x1], 0 }
   0xd   :  { %24 = vsyncpa [#allocation6], 0 }
   0xe   :  { %26 = vsyncpa [#allocation6 + $0x1], 0 }
   0xf   :  { %27 = vsyncpa [#allocation9], 0 }
  0x10   :  { %28 = vsyncpa [#allocation12], 0 }
  0x11   :  { %29 = vsyncpa [#allocation15], 0 }
  0x12   :  { %30 = vsyncpa [#allocation4], 0 }
  0x13   :  { %32 = vsyncpa [#allocation4 + $0x1], 0  ;;  %s3169_s21 = smov 0   ;;  %s3171_s22 = smov 0  }
  0x14   :  { %s3173_s23 = smov 0   ;;  %s3175_s24 = smov 0  }
  0x15 LB: > { %3745 = sst [smem:[#allocation25_spill]] %s3064_s23  ;;  %s3070_s25 = smov [#allocation7]   ;;  %s3068_s24 = sphi %s3175_s24, %s3783_s24   ;;  %s3064_s23 = sphi %s3173_s23, %s3780_s23   ;;  %s3060_s22 = sphi %s3171_s22, %s3782_s22   ;;  %s3056_s21 = sphi %s3169_s21, %s3781_s21  }
  0x16   : > { %s430_s26 = sshll.u32 %s3070_s25, 4  ;;  %s3190_s27 = sadd.s32 4294967295, %s3068_s24   ;;  %s431_s26 = int_to_ptr.vmem [resolvable:$true] %s430_s26 }
  0x17   : > { %p2200_p0 = scmp.ge.s32.totalorder %s3068_s24, 1  ;;  %p3730_p1 = scmp.eq.s32.totalorder %s3190_s27, 0 }
  0x18   : > { %p415_p2 = scmp.lt.s32.totalorder %s3068_s24, 3  ;;  %s3071_s29 = smov [#allocation8]  }
  0x19   : > { %s446_s30 = sshll.u32 %s3071_s29, 4  ;;  %s3072_s17 = smov [#allocation11]   ;;  %s3208_s30 = int_to_ptr.vmem [resolvable:$true] %s446_s30 }
  0x1a   : > { %p3195_p3 = pnand %p2200_p0, %p415_p2  ;;  %s481_s18 = sshll.u32 %s3072_s17, 4  ;;  %s3210_s18 = int_to_ptr.vmem [resolvable:$true] %s481_s18 }
  0x1b   : > { %s2757_s20 = scalar_lea.vmem %s431_s26, 512  ;;  %p2765_p11 = scmp.lt.s32.totalorder %s431_s26, %s431_s26 }
  0x1c   : > { %s3746_s28 = scalar_select %p3195_p3, 1, 0 }
  0x1d   : > { %p2654_p5 = pneg %p3195_p3  ;;  %p2758_p8 = scmp.ne.s32.totalorder %s431_s26, %s2757_s20 }
  0x1e   : > { %p2766_p12 = scmp.lt.s32.totalorder %s2757_s20, %s2757_s20 }
  0x1f   : > { %p3204_p6 = pnand %p2654_p5, %p3730_p1 }
  0x20   : > { %p2767_p13 = por %p2766_p12, %p2765_p11 }
  0x21   : > { %p3214_p7 = pneg %p3204_p6 }
  0x23   : > { %p2760_p9 = pnand %p2758_p8, %p3214_p7 }
  0x25   : > { %p2761_p10 = pneg %p2760_p9 }
  0x27   : > { %p2768_p0 = pnand %p2767_p13, %p2761_p10 }
  0x29   : > { %2771 = shalt.err (!%p2768_p0)
}
  0x2a   : > { %s3728_s25 = smov 128   ;;  %s3729_s29 = smov 8  }
  0x2b   : > { %s3749_s3 = sld [smem:[#allocation28_spill]]  ;;  %s2783_s14 = scalar_lea.vmem %s3208_s30, 256 }
  0x2c   : > { %p2784_p2 = scmp.ne.s32.totalorder %s3208_s30, %s2783_s14  ;;  %p2791_p9 = scmp.lt.s32.totalorder %s3208_s30, %s3208_s30 }
  0x2d   : > { %p2792_p10 = scmp.lt.s32.totalorder %s2783_s14, %s2783_s14 }
  0x2e   : > { %p2786_p5 = pnand %p2784_p2, %p3214_p7 }
  0x2f   : > { %p2793_p11 = por %p2792_p10, %p2791_p9 }
  0x30   : > { %p2787_p8 = pneg %p2786_p5 }
  0x31   : > { %2657 = dma.hbm_to_vmem [thread:$0]  (!%p3204_p6), %s3749_s3, 512, %s431_s26, [#allocation6], %s3728_s25, %s3728_s25, %s3729_s29  }
  0x32   : > { %p2794_p12 = pnand %p2793_p11, %p2787_p8 }
  0x34   : > { %2797 = shalt.err (!%p2794_p12)
}
  0x35   : > { %s3750_s5 = sld [smem:[#allocation29_spill]]  ;;  %s2809_s26 = scalar_lea.vmem %s3210_s18, 512 }
  0x36   : > { %p2810_p13 = scmp.ne.s32.totalorder %s3210_s18, %s2809_s26  ;;  %p2817_p5 = scmp.lt.s32.totalorder %s3210_s18, %s3210_s18 }
  0x37   : > { %p2818_p8 = scmp.lt.s32.totalorder %s2809_s26, %s2809_s26 }
  0x38   : > { %p2812_p0 = pnand %p2810_p13, %p3214_p7 }
  0x39   : > { %p2819_p9 = por %p2818_p8, %p2817_p5 }
  0x3a   : > { %p2813_p2 = pneg %p2812_p0 }
  0x3b   : > { %2660 = dma.hbm_to_vmem [thread:$0]  (!%p3204_p6), %s3750_s5, 256, %s3208_s30, [#allocation9], %s3728_s25, %s3728_s25, %s3729_s29  }
  0x3c   : > { %p2820_p10 = pnand %p2819_p9, %p2813_p2 }
  0x3e   : > { %2823 = shalt.err (!%p2820_p10)
}
  0x3f   : > { %s3751_s10 = sld [smem:[#allocation31_spill]]  ;;  %s3075_s30 = smov [#allocation14]  }
  0x40   : > { %s510_s20 = sshll.u32 %s3075_s30, 4  ;;  %s3076_s16 = smov [#allocation10]   ;;  %s511_s20 = int_to_ptr.vmem [resolvable:$true] %s510_s20 }
  0x41   : > { %s459_s3 = sshll.u32 %s3076_s16, 4  ;;  %s2835_s26 = scalar_lea.vmem %s511_s20, 2048  ;;  %s460_s3 = int_to_ptr.vmem [resolvable:$true] %s459_s3 }
  0x42   : > { %p2836_p11 = scmp.ne.s32.totalorder %s511_s20, %s2835_s26  ;;  %p2843_p0 = scmp.lt.s32.totalorder %s511_s20, %s511_s20 }
  0x43   : > { %p2844_p2 = scmp.lt.s32.totalorder %s2835_s26, %s2835_s26 }
  0x44   : > { %p2838_p12 = pnand %p2836_p11, %p3214_p7 }
  0x45   : > { %2666 = dma.hbm_to_vmem [thread:$0]  (!%p3204_p6), %s3751_s10, 512, %s3210_s18, [#allocation12], %s3728_s25, %s3728_s25, %s3729_s29  }
  0x46   : > { %p2839_p13 = pneg %p2838_p12  ;;  %p2845_p5 = por %p2844_p2, %p2843_p0 }
  0x48   : > { %p2846_p8 = pnand %p2845_p5, %p2839_p13 }
  0x4a   : > { %2849 = shalt.err (!%p2846_p8)
}
  0x4b   : > { %s3752_s13 = sld [smem:[#allocation33_spill]]  ;;  %s2861_s17 = scalar_lea.vmem %s460_s3, 256 }
  0x4c   : > { %p2862_p9 = scmp.ne.s32.totalorder %s460_s3, %s2861_s17  ;;  %p2869_p12 = scmp.lt.s32.totalorder %s460_s3, %s460_s3 }
  0x4d   : > { %p2870_p0 = scmp.lt.s32.totalorder %s2861_s17, %s2861_s17 }
  0x4e   : > { %p2864_p10 = pnand %p2862_p9, %p3214_p7 }
  0x4f   : > { %p2871_p13 = por %p2870_p0, %p2869_p12 }
  0x50   : > { %p2865_p11 = pneg %p2864_p10 }
  0x51   : > { %2672 = dma.hbm_to_vmem [thread:$0]  (!%p3204_p6), %s3752_s13, 2048, %s511_s20, [#allocation15], %s3728_s25, %s3728_s25, %s3729_s29  }
  0x52   : > { %p2872_p2 = pnand %p2871_p13, %p2865_p11 }
  0x54   : > { %2875 = shalt.err (!%p2872_p2)
}
  0x55   : > { %s3753_s6 = sld [smem:[#allocation30_spill]]  ;;  %s3077_s20 = smov [#allocation13]  }
  0x56   : > { %s497_s26 = sshll.u32 %s3077_s20, 4  ;;  %s3078_s18 = smov [#allocation16]   ;;  %s498_s26 = int_to_ptr.vmem [resolvable:$true] %s497_s26 }
  0x57   : > { %s526_s14 = sshll.u32 %s3078_s18, 4  ;;  %s2887_s5 = scalar_lea.vmem %s498_s26, 512  ;;  %s527_s14 = int_to_ptr.vmem [resolvable:$true] %s526_s14 }
  0x58   : > { %p2888_p5 = scmp.ne.s32.totalorder %s498_s26, %s2887_s5  ;;  %p2895_p10 = scmp.lt.s32.totalorder %s498_s26, %s498_s26 }
  0x59   : > { %p2896_p11 = scmp.lt.s32.totalorder %s2887_s5, %s2887_s5 }
  0x5a   : > { %p2890_p8 = pnand %p2888_p5, %p3214_p7 }
  0x5b   : > { %2663 = dma.hbm_to_vmem [thread:$0]  (!%p3204_p6), %s3753_s6, 256, %s460_s3, [#allocation9], %s3728_s25, %s3728_s25, %s3729_s29  }
  0x5c   : > { %p2891_p9 = pneg %p2890_p8  ;;  %p2897_p12 = por %p2896_p11, %p2895_p10 }
  0x5e   : > { %p2898_p0 = pnand %p2897_p12, %p2891_p9 }
  0x60   : > { %2901 = shalt.err (!%p2898_p0)
}
  0x61   : > { %s3754_s12 = sld [smem:[#allocation32_spill]]  ;;  %s2913_s30 = scalar_lea.vmem %s527_s14, 2048 }
  0x62   : > { %p2914_p13 = scmp.ne.s32.totalorder %s527_s14, %s2913_s30  ;;  %p2921_p8 = scmp.lt.s32.totalorder %s527_s14, %s527_s14 }
  0x63   : > { %p2922_p10 = scmp.lt.s32.totalorder %s2913_s30, %s2913_s30 }
  0x64   : > { %p2916_p2 = pnand %p2914_p13, %p3214_p7 }
  0x65   : > { %p2923_p9 = por %p2922_p10, %p2921_p8 }
  0x66   : > { %p2917_p5 = pneg %p2916_p2 }
  0x67   : > { %2669 = dma.hbm_to_vmem [thread:$0]  (!%p3204_p6), %s3754_s12, 512, %s498_s26, [#allocation12], %s3728_s25, %s3728_s25, %s3729_s29  }
  0x68   : > { %p2924_p11 = pnand %p2923_p9, %p2917_p5 }
  0x6a   : > { %2927 = shalt.err (!%p2924_p11)
}
  0x6b   : > { %s3755_s15 = sld [smem:[#allocation35_spill]]  ;;  %s2199_s0 = sadd.s32 4294967294, %s3068_s24  }
  0x6c   : > { %s3300_s19 = sadd.s32 1, %s3068_s24   ;;  %s45_s20 = sadd.s32 1, %s3064_s23 }
  0x6d   : > { %s42_s26 = ssub.s32 %s3068_s24, %s3300_s19  ;;  %p52_p7 = scmp.ne.s32.totalorder %s3064_s23, %s3060_s22 }
  0x6e   : > { %p43_p12 = scmp.eq.s32.totalorder %s42_s26, 0  ;;  %p53_p0 = scmp.eq.s32.totalorder %s3068_s24, 0 }
  0x6f   : > { %p58_p13 = scmp.ne.s32.totalorder %s3060_s22, %s3056_s21  ;;  %p402_p2 = scmp.eq.s32.totalorder %s3190_s27, 1 }
  0x70   : > { %s3312_s18 = scalar_select %p43_p12, %s3064_s23, %s45_s20  }
  0x71   : > { %2675 = dma.hbm_to_vmem [thread:$0]  (!%p3204_p6), %s3755_s15, 2048, %s527_s14, [#allocation15], %s3728_s25, %s3728_s25, %s3729_s29  }
  0x72   : > { %3756 = sst [smem:[#allocation26_spill]] %s3312_s18  ;;  %p54_p5 = por %p53_p0, %p52_p7 }
  0x73   : > { %p3316_p8 = por %p3730_p1, %p58_p13  ;;  %p3320_p6 = por %p402_p2, %p52_p7 }
  0x74   : > { %p408_p10 = scmp.eq.s32.totalorder %s2199_s0, 1  ;;  %p2694_p9 = scmp.lt.s32.totalorder %s3068_s24, 2 }
  0x75   : > { %s3757_s3 = scalar_select %p3316_p8, 1, 0 }
  0x76   : > { %s3758_s14 = scalar_select %p3320_p6, 1, 0 }
  0x77   : > { %s3326_s17 = sand.u32 1, %s3064_s23   ;;  %p3328_p11 = por %p408_p10, %p58_p13 }
  0x78   : > { %s2209_s5 = sshll.u32 %s3326_s17, 3  ;;  %s2210_s16 = sshll.u32 %s3068_s24, 7 }
  0x79   : > { %s3759_s30 = scalar_select %p3328_p11, 1, 0 }
  0x7a   : > { %s3760_s25 = sld [smem:[#allocation27_spill]]  ;;  %s544_s0 = scalar_lea.vmem [#allocation2], %s2209_s5 }
  0x7b   : > { %s551_s6 = sshll.u32 %s544_s0, 4  ;;  %p3339_p7 = pnand %p2694_p9, %p54_p5  ;;  %s552_s6 = int_to_ptr.vmem [resolvable:$true] %s551_s6 }
  0x7c   : > { %s2211_s12 = sshll.u32 %s3326_s17, 4  ;;  %s541_s13 = scalar_lea.sflag [#allocation3], %s3326_s17 }
  0x7d   : > { %p2930_p0 = pneg %p3339_p7 }
  0x80   : > { %s3337_s29 = scalar_lea.hbm %s3760_s25, %s2210_s16  ;;  %s2933_s20 = scalar_lea.hbm %s3760_s25, 256 }
  0x81   : > { %s2928_s15 = scalar_lea.hbm %s3337_s29, 128  ;;  %p2934_p5 = scmp.lt.s32.totalorder %s3337_s29, %s3760_s25 }
  0x82   : > { %p2929_p12 = scmp.ne.s32.totalorder %s3337_s29, %s2928_s15  ;;  %p2935_p10 = scmp.lt.s32.totalorder %s2933_s20, %s2928_s15 }
  0x84   : > { %p2931_p13 = pnand %p2930_p0, %p2929_p12  ;;  %p2936_p9 = por %p2935_p10, %p2934_p5 }
  0x86   : > { %p2932_p2 = pneg %p2931_p13 }
  0x88   : > { %p2937_p4 = pnand %p2936_p9, %p2932_p2 }
  0x8a   : > { %2940 = shalt.err (!%p2937_p4)
}
  0x8b   : > { %s2941_s17 = scalar_lea.vmem %s552_s6, 128  ;;  %s3079_s18 = smov [#allocation2]  }
  0x8c   : > { %p2942_p1 = scmp.ne.s32.totalorder %s552_s6, %s2941_s17  ;;  %s2946_s23 = sshll.u32 %s3079_s18, 4  ;;  %s2947_s23 = int_to_ptr.vmem [resolvable:$false] %s2946_s23 }
  0x8d   : > { %s2948_s16 = scalar_lea.vmem %s2947_s23, 256  ;;  %p2949_p13 = scmp.lt.s32.totalorder %s552_s6, %s2947_s23 }
  0x8e   : > { %p2944_p11 = pnand %p2942_p1, %p2930_p0  ;;  %p2950_p6 = scmp.lt.s32.totalorder %s2948_s16, %s2941_s17 }
  0x90   : > { %p2945_p12 = pneg %p2944_p11  ;;  %p2951_p8 = por %p2950_p6, %p2949_p13 }
  0x92   : > { %p2952_p3 = pnand %p2951_p8, %p2945_p12 }
  0x94   : > { %2955 = shalt.err (!%p2952_p3)
}
  0x95   : > { %2679 = dma.hbm_to_vmem [thread:$0]  (!%p3339_p7), %s3337_s29, 128, %s552_s6, %s541_s13  }
  0x96   : > { %s562_s15 = scalar_lea.vmem [#allocation5], %s2211_s12  ;;  %s558_s20 = sand.u32 1, %s3068_s24  }
  0x97   : > { %s569_s5 = sshll.u32 %s562_s15, 4  ;;  %s2252_s18 = sshll.u32 %s3068_s24, 8  ;;  %s3366_s5 = int_to_ptr.vmem [resolvable:$true] %s569_s5 }
  0x98   : > { %s3372_s23 = scalar_lea.hbm %s3710_s1, %s2252_s18  ;;  %s559_s17 = scalar_lea.sflag [#allocation6], %s558_s20 }
  0x99   : > { %s2956_s16 = scalar_lea.hbm %s3372_s23, 256  ;;  %s2961_s13 = scalar_lea.hbm %s3710_s1, 512 }
  0x9a   : > { %p2957_p1 = scmp.ne.s32.totalorder %s3372_s23, %s2956_s16  ;;  %p2962_p8 = scmp.lt.s32.totalorder %s3372_s23, %s3710_s1 }
  0x9b   : > { %p2963_p6 = scmp.lt.s32.totalorder %s2961_s13, %s2956_s16 }
  0x9c   : > { %p2959_p3 = pnand %p2957_p1, %p2930_p0 }
  0x9d   : > { %p2964_p11 = por %p2963_p6, %p2962_p8 }
  0x9e   : > { %p2960_p4 = pneg %p2959_p3 }
  0xa0   : > { %p2965_p2 = pnand %p2964_p11, %p2960_p4 }
  0xa2   : > { %2968 = shalt.err (!%p2965_p2)
}
  0xa3   : > { %s2969_s20 = scalar_lea.vmem %s3366_s5, 256  ;;  %s3080_s18 = smov [#allocation5]  }
  0xa4   : > { %p2970_p5 = scmp.ne.s32.totalorder %s3366_s5, %s2969_s20  ;;  %s2974_s26 = sshll.u32 %s3080_s18, 4  ;;  %s2975_s26 = int_to_ptr.vmem [resolvable:$false] %s2974_s26 }
  0xa5   : > { %s2976_s0 = scalar_lea.vmem %s2975_s26, 512  ;;  %p2977_p12 = scmp.lt.s32.totalorder %s3366_s5, %s2975_s26 }
  0xa6   : > { %p2972_p10 = pnand %p2970_p5, %p2930_p0  ;;  %p2978_p13 = scmp.lt.s32.totalorder %s2976_s0, %s2969_s20 }
  0xa8   : > { %p2973_p9 = pneg %p2972_p10  ;;  %p2979_p1 = por %p2978_p13, %p2977_p12 }
  0xaa   : > { %p2980_p3 = pnand %p2979_p1, %p2973_p9 }
  0xac   : > { %2983 = shalt.err (!%p2980_p3)
}
  0xad   : > { %s3762_s16 = smov 8   ;;  %s3763_s6 = smov 128  }
  0xae   : > { %2682 = dma.hbm_to_vmem [thread:$0]  (!%p3339_p7), %s3372_s23, 256, %s3366_s5, %s559_s17, %s3763_s6, %s3763_s6, %s3762_s16  }
  0xaf   : > { %p3764_p0 = scmp.ne.s32.totalorder %s3746_s28, 0 }
  0xb0   : > { %s3402_s12 = sand.u32 (!%p3764_p0), 1, %s3060_s22   ;;  %p3765_p4 = scmp.ne.s32.totalorder (!%p3764_p0), %s3757_s3, 0 }
  0xb1   : > { %581 = sbr.rel (%p3764_p0) target bundleno = 1899 (0x76b), region = 84  ;;  %s2215_s13 = sshll.u32 (!%p3764_p0), %s3402_s12, 3 }
  0xb2   : > { %s584_s29 = scalar_lea.sflag (!%p3764_p0), [#allocation3], %s3402_s12  ;;  %s587_s15 = scalar_lea.vmem (!%p3764_p0), [#allocation2], %s2215_s13 }
  0xb6   : > { %3027 = dma.done.wait (%p3765_p4), %s584_s29, 128  }
  0xb7   : > { %3029 = vsyncadd (%p3765_p4), %s584_s29, 4294967168  ;;  %s592_s10 = sand.u32 1, %s3190_s27   ;;  %s2216_s28 = sshll.u32 %s3402_s12, 4 }
  0xb8   : > { %s593_s5 = scalar_lea.sflag [#allocation6], %s592_s10  ;;  %s3414_s23 = scalar_lea.vmem [#allocation5], %s2216_s28 }
  0xb9   : > { %3031 = dma.done.wait (%p3765_p4), %s593_s5, 256  }
  0xba   : > { %3033 = vsyncadd (%p3765_p4), %s593_s5, 4294967040  ;;  %p3766_p7 = scmp.eq.s32.totalorder %s3190_s27, 0 }
  0xbc   : > { %3035 = dma.done.wait (%p3766_p7), [#allocation6], 512   ;;  %p3767_p8 = pmov %p3766_p7 }
  0xbd   : > { %p3768_p6 = pmov %p3766_p7 }
  0xbe   : > { %3037 = vsyncadd (%p3767_p8), [#allocation6], 4294966784 }
  0xbf   : > { %3039 = dma.done.wait (%p3768_p6), [#allocation9], 512   ;;  %p3769_p11 = pmov %p3768_p6 }
  0xc0   : > { %p3770_p2 = pmov %p3768_p6 }
  0xc1   : > { %3041 = vsyncadd (%p3769_p11), [#allocation9], 4294966784 }
  0xc2   : > { %3043 = dma.done.wait (%p3770_p2), [#allocation12], 1024   ;;  %p3771_p5 = pmov %p3770_p2 }
  0xc3   : > { %p3772_p10 = pmov %p3770_p2 }
  0xc4   : > { %3045 = vsyncadd (%p3771_p5), [#allocation12], 4294966272 }
  0xc5   : > { %3047 = dma.done.wait (%p3772_p10), [#allocation15], 4096   ;;  %p3773_p9 = pmov %p3770_p2 }
  0xc6   : > { %vm689_vm0 = vcmask 64512   ;;  %v684_v0 = vld [vmem:[%s587_s15] sm:$0xff]  ;;  %v782_v3 = vld [vmem:[%s3713_s4 + $0x38] sm:$0xff]  ;;  %v781_v4 = vld [vmem:[%s3713_s4 + $0x30] sm:$0xff]  ;;  %vm783_vm1 = vcmask 523264   ;;  %vm865_vm2 = vcmask 261120   ;;  %v964_v20 = vlaneseq }
  0xc7   : > { %3049 = vsyncadd (%p3773_p9), [#allocation15], 4294963200  ;;  %v687_v1 = vld [vmem:[%s3711_s2] sm:$0xff]  ;;  %v688_v2 = vld [vmem:[%s3711_s2 + $0x8] sm:$0xff]  ;;  %2381 = vmatprep.subr.mxu0 %v684_v0  ;;  %2386 = vmatprep.subr.mxu1 %v782_v3  ;;  %vm970_vm3 = vcmask 130048   ;;  %s677_s6 = scalar_lea.vmem [#allocation17], %s2216_s28 }
  0xc8   : > { %2383 = vmatprep.mubr.msk.f32.mxu0 %vm689_vm0, %v687_v1  ;;  %2382 = vmatpush3.msra.mxu0 %v684_v0  ;;  %v780_v5 = vld [vmem:[%s3713_s4 + $0x28] sm:$0xff]  ;;  %v773_v7 = vld [vmem:[#allocation7 + $0x10] sm:$0xff]  ;;  %v778_v9 = vld [vmem:[%s3713_s4 + $0x18] sm:$0xff]  ;;  %v3474_v21 = vshrl.u32 %v964_v20, 7  ;;  %s2037_s13 = sshll.u32 %s677_s6, 4  ;;  %s2253_s29 = sshll.u32 %s3190_s27, 8  ;;  %s3661_s13 = int_to_ptr.vmem [resolvable:$true] %s2037_s13 }
  0xc9   : > { %2384 = vmatmul.mubr.msk.f32.vlgmr.msra.gmra.mxu0 %vm689_vm0, %v688_v2  ;;  %2387 = vmatpush3.msra.mxu1 %v782_v3  ;;  %v774_v6 = vld [vmem:[#allocation7 + $0x18] sm:$0xff]  ;;  %v779_v8 = vld [vmem:[%s3713_s4 + $0x20] sm:$0xff]  ;;  %v777_v10 = vld [vmem:[%s3713_s4 + $0x10] sm:$0xff]  ;;  %s3775_s5 = sld [smem:[#allocation36_spill]]  ;;  %s2024_s17 = scalar_lea.sflag [#allocation4], %s3402_s12 }
  0xca   : > { %2388 = vmatprep.subr.mxu1 %v781_v4  ;;  %2405 = vmatprep.subr.mxu0 %v774_v6  ;;  %v776_v11 = vld [vmem:[%s3713_s4 + $0x8] sm:$0xff]  ;;  %v775_v12 = vld [vmem:[%s3713_s4] sm:$0xff]  ;;  %v772_v13 = vld [vmem:[#allocation7 + $0x8] sm:$0xff]  ;;  %v3477_v22 = vsub.s32 0, %v3474_v21  ;;  %v3537_v47 = vsub.s32 1, %v3474_v21  ;;  %s2984_s28 = scalar_lea.vmem %s3661_s13, 256 }
  0xcb   : > { %2389 = vmatpush3.msra.mxu1 %v781_v4  ;;  %2406 = vmatpush3.msra.mxu0 %v774_v6  ;;  %v685_v14 = vld [vmem:[%s3414_s23] sm:$0xff]  ;;  %v686_v15 = vld [vmem:[%s3414_s23 + $0x8] sm:$0xff]  ;;  %s3774_s23 = sld [smem:[#allocation34_spill]]  ;;  %p2985_p12 = scmp.ne.s32.totalorder %s3661_s13, %s2984_s28 }
  0xcc   : > { %2390 = vmatprep.subr.mxu1 %v780_v5  ;;  %2407 = vmatprep.subr.mxu0 %v773_v7  ;;  %v771_v16 = vld [vmem:[#allocation7] sm:$0xff]  ;;  %v3482_v23 = vld [vmem:[%s3717_s8] sm:$0x7]  ;;  %v3492_v33 = vld [vmem:[#allocation8 + $0x8] sm:$0xff]  ;;  %p3776_p13 = scmp.ne.s32.totalorder %s3758_s14, 0  ;;  %s3081_s27 = smov [#allocation17]  }
  0xcd   : > { %2391 = vmatpush3.msra.mxu1 %v780_v5  ;;  %2408 = vmatpush3.msra.mxu0 %v773_v7  ;;  %v3470_v19 = vld [vmem:[#allocation8] sm:$0xff]  ;;  %v967_v25 = vrot.slane %v3482_v23, %v3477_v22  ;;  %v963_v34 = vld [vmem:[%s3716_s7 + $0x78] sm:$0xff]  ;;  %v961_v36 = vld [vmem:[%s3716_s7 + $0x68] sm:$0xff]  ;;  %v1130_v50 = vrot.slane %v3482_v23, %v3537_v47  ;;  %s2988_s20 = sshll.u32 %s3081_s27, 4  ;;  %s2989_s20 = int_to_ptr.vmem [resolvable:$false] %s2988_s20 }
  0xce   : > { %2392 = vmatprep.subr.mxu1 %v779_v8  ;;  %2409 = vmatprep.subr.mxu0 %v772_v13  ;;  %v962_v35 = vld [vmem:[%s3716_s7 + $0x70] sm:$0xff]  ;;  %v960_v37 = vld [vmem:[%s3716_s7 + $0x60] sm:$0xff]  ;;  %v959_v38 = vld [vmem:[%s3716_s7 + $0x58] sm:$0xff]  ;;  %p2986_p1 = pnand %p2985_p12, %p3776_p13  ;;  %s2990_s18 = scalar_lea.vmem %s2989_s20, 512 }
  0xcf   : > { %2393 = vmatpush3.msra.mxu1 %v779_v8  ;;  %2402 = vmatprep.mubr.msk.f32.mxu1 %vm783_vm1, %v685_v14  ;;  %v958_v39 = vld [vmem:[%s3716_s7 + $0x50] sm:$0xff]  ;;  %v957_v40 = vld [vmem:[%s3716_s7 + $0x48] sm:$0xff]  ;;  %v956_v41 = vld [vmem:[%s3716_s7 + $0x40] sm:$0xff]  ;;  %s3666_s3 = scalar_lea.hbm %s3775_s5, %s2253_s29  ;;  %p2991_p0 = scmp.lt.s32.totalorder %s3661_s13, %s2989_s20 }
  0xd0   : > { %2394 = vmatprep.subr.mxu1 %v778_v9  ;;  %2410 = vmatpush3.msra.mxu0 %v772_v13  ;;  %v955_v42 = vld [vmem:[%s3716_s7 + $0x38] sm:$0xff]  ;;  %v954_v43 = vld [vmem:[%s3716_s7 + $0x30] sm:$0xff]  ;;  %v953_v44 = vld [vmem:[%s3716_s7 + $0x28] sm:$0xff]  ;;  %p2987_p3 = pneg %p2986_p1  ;;  %p2992_p4 = scmp.lt.s32.totalorder %s2990_s18, %s2984_s28 }
  0xd1   : > { %2395 = vmatpush3.msra.mxu1 %v778_v9  ;;  %2411 = vmatprep.subr.mxu0 %v771_v16  ;;  %v952_v45 = vld [vmem:[%s3716_s7 + $0x20] sm:$0xff]  ;;  %v951_v46 = vld [vmem:[%s3716_s7 + $0x18] sm:$0xff]  ;;  %v950_v48 = vld [vmem:[%s3716_s7 + $0x10] sm:$0xff] }
  0xd2   : > { %2396 = vmatprep.subr.mxu1 %v777_v10  ;;  %2412 = vmatpush3.msra.mxu0 %v771_v16  ;;  %v949_v49 = vld [vmem:[%s3716_s7 + $0x8] sm:$0xff]  ;;  %v948_v51 = vld [vmem:[%s3716_s7] sm:$0xff]  ;;  %v1239_v56 = vld [vmem:[%s3718_s9 + $0x78] sm:$0xff]  ;;  %p2993_p7 = por %p2992_p4, %p2991_p0 }
  0xd3   : > { %2397 = vmatpush3.msra.mxu1 %v777_v10  ;;  %v3551_v53 = vld [vmem:[#allocation10] sm:$0xff]  ;;  %v3557_v55 = vld [vmem:[#allocation10 + $0x8] sm:$0xff]  ;;  %v1238_v57 = vld [vmem:[%s3718_s9 + $0x70] sm:$0xff] }
  0xd4   : > { %2398 = vmatprep.subr.mxu1 %v776_v11  ;;  %v1237_v58 = vld [vmem:[%s3718_s9 + $0x68] sm:$0xff]  ;;  %v1236_v59 = vld [vmem:[%s3718_s9 + $0x60] sm:$0xff]  ;;  %v1235_v60 = vld [vmem:[%s3718_s9 + $0x58] sm:$0xff]  ;;  %p2994_p8 = pnand %p2993_p7, %p2987_p3 }
  0xd5   : > { %2399 = vmatpush3.msra.mxu1 %v776_v11  ;;  %v1234_v61 = vld [vmem:[%s3718_s9 + $0x50] sm:$0xff]  ;;  %v1233_v62 = vld [vmem:[%s3718_s9 + $0x48] sm:$0xff]  ;;  %v1232_v63 = vld [vmem:[%s3718_s9 + $0x40] sm:$0xff]  ;;  %v3612_v11 = vsub.s32 2, %v3474_v21 }
  0xd6   : > { %2400 = vmatprep.subr.mxu1 %v775_v12  ;;  %v1231_v0 = vld [vmem:[%s3718_s9 + $0x38] sm:$0xff]  ;;  %v1230_v1 = vld [vmem:[%s3718_s9 + $0x30] sm:$0xff]  ;;  %v1229_v2 = vld [vmem:[%s3718_s9 + $0x28] sm:$0xff] }
  0xd7   : > { %2401 = vmatpush3.msra.mxu1 %v775_v12  ;;  %v1228_v3 = vld [vmem:[%s3718_s9 + $0x20] sm:$0xff]  ;;  %v1227_v4 = vld [vmem:[%s3718_s9 + $0x18] sm:$0xff]  ;;  %v1226_v5 = vld [vmem:[%s3718_s9 + $0x10] sm:$0xff] }
  0xd8   : > { %2403 = vmatmul.mubr.msk.f32.vlgmr.msra.gmra.mxu1 %vm783_vm1, %v686_v15  ;;  %2465 = vmatprep.subr.mxu1 %v1239_v56  ;;  %v1225_v6 = vld [vmem:[%s3718_s9 + $0x8] sm:$0xff]  ;;  %v1224_v7 = vld [vmem:[%s3718_s9] sm:$0xff]  ;;  %v1219_v15 = vrot.slane %v3482_v23, %v3612_v11 }
  0xd9   : > { %2466 = vmatpush3.msra.mxu1 %v1239_v56  ;;  %v1317_v21 = vld [vmem:[%s3720_s11] sm:$0x7] }
  0xda   : > { %2467 = vmatprep.subr.mxu1 %v1238_v57  ;;  %v1487_v23 = vrot.slane %v1317_v21, %v3537_v47  ;;  %v1570_v56 = vrot.slane %v1317_v21, %v3612_v11 }
  0xdb   : > { %2468 = vmatpush3.msra.mxu1 %v1238_v57 }
  0xdc   : > { %2469 = vmatprep.subr.mxu1 %v1237_v58 }
  0xdd   : > { %2470 = vmatpush3.msra.mxu1 %v1237_v58 }
  0xde   : > { %2471 = vmatprep.subr.mxu1 %v1236_v59 }
  0xdf   : > { %2472 = vmatpush3.msra.mxu1 %v1236_v59 }
  0xe0   : > { %2473 = vmatprep.subr.mxu1 %v1235_v60 }
  0xe1   : > { %2474 = vmatpush3.msra.mxu1 %v1235_v60 }
  0xe2   : > { %2475 = vmatprep.subr.mxu1 %v1234_v61 }
  0xe3   : > { %2476 = vmatpush3.msra.mxu1 %v1234_v61 }
  0xe4   : > { %2477 = vmatprep.subr.mxu1 %v1233_v62 }
  0xe5   : > { %2478 = vmatpush3.msra.mxu1 %v1233_v62 }
  0xe6   : > { %2479 = vmatprep.subr.mxu1 %v1232_v63 }
  0xe7   : > { %2480 = vmatpush3.msra.mxu1 %v1232_v63 }
  0xe8   : > { %2481 = vmatprep.subr.mxu1 %v1231_v0 }
  0xe9   : > { %2482 = vmatpush3.msra.mxu1 %v1231_v0 }
  0xea   : > { %2483 = vmatprep.subr.mxu1 %v1230_v1 }
  0xeb   : > { %2484 = vmatpush3.msra.mxu1 %v1230_v1  ;;  %v3639_v1 = vld [vmem:[%s3774_s23] sm:$0x7] }
  0xec   : > { %2485 = vmatprep.subr.mxu1 %v1229_v2 }
  0xed   : > { %2486 = vmatpush3.msra.mxu1 %v1229_v2 }
  0xee   : > { %2487 = vmatprep.subr.mxu1 %v1228_v3 }
  0xef   : > { %2488 = vmatpush3.msra.mxu1 %v1228_v3 }
  0xf0   : > { %2489 = vmatprep.subr.mxu1 %v1227_v4 }
  0xf1   : > { %2490 = vmatpush3.msra.mxu1 %v1227_v4  ;;  %v1684_v4 = vrot.slane %v3639_v1, %v3477_v22 }
  0xf2   : > { %2491 = vmatprep.subr.mxu1 %v1226_v5 }
  0xf3   : > { %2492 = vmatpush3.msra.mxu1 %v1226_v5  ;;  %v1840_v5 = vrot.slane %v3639_v1, %v3537_v47  ;;  %v1677_v47 = vld [vmem:[#allocation14 + $0x60] sm:$0xff] }
  0xf4   : > { %2493 = vmatprep.subr.mxu1 %v1225_v6 }
  0xf5   : > { %2494 = vmatpush3.msra.mxu1 %v1225_v6 }
  0xf6   : > { %2495 = vmatprep.subr.mxu1 %v1224_v7 }
  0xf7   : > { %2496 = vmatpush3.msra.mxu1 %v1224_v7 }
 0x189   : > { %v2385_v17 = vpop.f32.mrf.mxu0 }
 0x18b   : > { %v762_v18 = vpop.f32.mrf.mxu0 }
 0x18c   : > { %2413 = vmatprep.mubr.msk.f32.mxu0 %vm865_vm2, %v762_v18 }
 0x18d   : > { %2414 = vmatmul.mubr.msk.f32.vlgmr.msra.gmra.mxu0 %vm865_vm2, %v2385_v17 }
 0x18e   : > { %2420 = vmatprep.mubr.msk.f32.mxu0 %vm970_vm3, %v3470_v19 }
 0x198   : > { %v2404_v24 = vpop.f32.mrf.mxu1 }
 0x19a   : > { %v856_v28 = vpop.f32.mrf.mxu1 }
 0x24d   : > { %v2415_v26 = vpop.f32.mrf.mxu0 }
 0x24e   : > { %v3486_v27 = vadd.f32 %v2415_v26, %v2404_v24 }
 0x24f   : > { %v938_v29 = vpop.f32.mrf.mxu0 }
 0x250   : > { %v3488_v30 = vadd.f32 %v938_v29, %v856_v28  ;;  %v969_v31 = vmul.f32 %v967_v25, %v3486_v27  ;;  %v1132_v52 = vmul.f32 %v1130_v50, %v3486_v27  ;;  %v1325_v29 = vrot.slane %v1317_v21, %v3477_v22  ;;  %v1680_v22 = vld [vmem:[#allocation14 + $0x78] sm:$0xff] }
 0x251   : > { %v1943_v21 = vld [vmem:[#allocation16 + $0x78] sm:$0xff] }
 0x252   : > { %2416 = vmatprep.subr.mxu0 %v969_v31  ;;  %v968_v32 = vmul.f32 %v967_v25, %v3488_v30  ;;  %v1131_v54 = vmul.f32 %v1130_v50, %v3488_v30 }
 0x253   : > { %2417 = vmatpush3.msra.mxu0 %v969_v31 }
 0x254   : > { %2418 = vmatprep.subr.mxu0 %v968_v32 }
 0x255   : > { %2419 = vmatpush3.msra.mxu0 %v968_v32 }
 0x256   : > { %2421 = vmatmul.mubr.msk.f32.vlgmr.msra.gmra.mxu0 %vm970_vm3, %v3492_v33  ;;  %2423 = vmatprep.subr.mxu0 %v963_v34 }
 0x257   : > { %2424 = vmatpush3.msra.mxu0 %v963_v34  ;;  %2455 = vmatprep.mubr.f32.mxu0 %v3488_v30 }
 0x258   : > { %2425 = vmatprep.subr.mxu0 %v962_v35 }
 0x259   : > { %2426 = vmatpush3.msra.mxu0 %v962_v35 }
 0x25a   : > { %2427 = vmatprep.subr.mxu0 %v961_v36 }
 0x25b   : > { %2428 = vmatpush3.msra.mxu0 %v961_v36 }
 0x25c   : > { %2429 = vmatprep.subr.mxu0 %v960_v37 }
 0x25d   : > { %2430 = vmatpush3.msra.mxu0 %v960_v37 }
 0x25e   : > { %2431 = vmatprep.subr.mxu0 %v959_v38 }
 0x25f   : > { %2432 = vmatpush3.msra.mxu0 %v959_v38 }
 0x260   : > { %2433 = vmatprep.subr.mxu0 %v958_v39 }
 0x261   : > { %2434 = vmatpush3.msra.mxu0 %v958_v39 }
 0x262   : > { %2435 = vmatprep.subr.mxu0 %v957_v40 }
 0x263   : > { %2436 = vmatpush3.msra.mxu0 %v957_v40  ;;  %v1321_v40 = vld [vmem:[#allocation11 + $0x18] sm:$0xff] }
 0x264   : > { %2437 = vmatprep.subr.mxu0 %v956_v41 }
 0x265   : > { %2438 = vmatpush3.msra.mxu0 %v956_v41  ;;  %v1320_v41 = vld [vmem:[#allocation11 + $0x10] sm:$0xff] }
 0x266   : > { %2439 = vmatprep.subr.mxu0 %v955_v42 }
 0x267   : > { %2440 = vmatpush3.msra.mxu0 %v955_v42  ;;  %v1319_v42 = vld [vmem:[#allocation11 + $0x8] sm:$0xff] }
 0x268   : > { %2441 = vmatprep.subr.mxu0 %v954_v43 }
 0x269   : > { %2442 = vmatpush3.msra.mxu0 %v954_v43  ;;  %v1318_v43 = vld [vmem:[#allocation11] sm:$0xff] }
 0x26a   : > { %2443 = vmatprep.subr.mxu0 %v953_v44 }
 0x26b   : > { %2444 = vmatpush3.msra.mxu0 %v953_v44  ;;  %v1578_v44 = vld [vmem:[#allocation13 + $0x18] sm:$0xff] }
 0x26c   : > { %2445 = vmatprep.subr.mxu0 %v952_v45 }
 0x26d   : > { %2446 = vmatpush3.msra.mxu0 %v952_v45  ;;  %v1577_v45 = vld [vmem:[#allocation13 + $0x10] sm:$0xff] }
 0x26e   : > { %2447 = vmatprep.subr.mxu0 %v951_v46 }
 0x26f   : > { %2448 = vmatpush3.msra.mxu0 %v951_v46  ;;  %v1576_v46 = vld [vmem:[#allocation13 + $0x8] sm:$0xff] }
 0x270   : > { %2449 = vmatprep.subr.mxu0 %v950_v48 }
 0x271   : > { %2450 = vmatpush3.msra.mxu0 %v950_v48  ;;  %v1575_v48 = vld [vmem:[#allocation13] sm:$0xff] }
 0x272   : > { %2451 = vmatprep.subr.mxu0 %v949_v49 }
 0x273   : > { %2452 = vmatpush3.msra.mxu0 %v949_v49 }
 0x274   : > { %2453 = vmatprep.subr.mxu0 %v948_v51 }
 0x275   : > { %2454 = vmatpush3.msra.mxu0 %v948_v51 }
 0x276   : > { %2456 = vmatmul.mubr.f32.vlgmr.msra.gmra.mxu0 %v3486_v27  ;;  %2458 = vmatprep.subr.mxu0 %v1132_v52 }
 0x277   : > { %2459 = vmatpush3.msra.mxu0 %v1132_v52  ;;  %2462 = vmatprep.mubr.msk.f32.mxu0 %vm970_vm3, %v3551_v53 }
 0x278   : > { %2460 = vmatprep.subr.mxu0 %v1131_v54 }
 0x279   : > { %2461 = vmatpush3.msra.mxu0 %v1131_v54 }
 0x27a   : > { %2463 = vmatmul.mubr.msk.f32.vlgmr.msra.gmra.mxu0 %vm970_vm3, %v3557_v55 }
 0x27b   : > { %2504 = vmatprep.mubr.msk.f32.mxu0 %vm970_vm3, %v3470_v19 }
 0x316   : > { %v2422_v8 = vpop.f32.mrf.mxu0 }
 0x318   : > { %v1043_v9 = vpop.f32.mrf.mxu0 }
 0x336   : > { %v2457_v10 = vpop.f32.mrf.mxu0 }
 0x337   : > { %v1124_v13 = vadd.f32 %v2457_v10, %v2422_v8 }
 0x338   : > { %v1118_v12 = vpop.f32.mrf.mxu0 }
 0x339   : > { %v1119_v16 = vadd.f32 %v1118_v12, %v1043_v9 }
 0x33a   : > { %v2464_v14 = vpop.f32.mrf.mxu0 }
 0x33b   : > { %v1215_v17 = vadd.f32 %v2464_v14, %v1124_v13  ;;  %v1676_v14 = vld [vmem:[#allocation14 + $0x58] sm:$0xff] }
 0x33c   : > { %v1205_v18 = vpop.f32.mrf.mxu0 }
 0x33d   : > { %v1214_v20 = vadd.f32 %v1205_v18, %v1119_v16  ;;  %v1221_v24 = vadd.f32 %v1219_v15, %v1215_v17  ;;  %v1674_v16 = vld [vmem:[#allocation14 + $0x48] sm:$0xff]  ;;  %v1672_v17 = vld [vmem:[#allocation14 + $0x38] sm:$0xff] }
 0x33e   : > { %v1670_v18 = vld [vmem:[#allocation14 + $0x28] sm:$0xff] }
 0x33f   : > { %v1220_v25 = vadd.f32 %v1219_v15, %v1214_v20  ;;  %v1223_v28 = vmax.f32 %v1221_v24, 0.0  ;;  %v1675_v15 = vld [vmem:[#allocation14 + $0x50] sm:$0xff]  ;;  %v1669_v20 = vld [vmem:[#allocation14 + $0x20] sm:$0xff]  ;;  %v1668_v24 = vld [vmem:[#allocation14 + $0x18] sm:$0xff] }
 0x341   : > { %v1222_v26 = vmax.f32 %v1220_v25, 0.0  ;;  %v1667_v25 = vld [vmem:[#allocation14 + $0x10] sm:$0xff] }
 0x343   : > { %2497 = vmatprep.mubr.f32.mxu1 %v1222_v26  ;;  %v1666_v26 = vld [vmem:[#allocation14 + $0x8] sm:$0xff] }
 0x344   : > { %2498 = vmatmul.mubr.f32.vlgmr.msra.gmra.mxu1 %v1223_v28  ;;  %v1665_v28 = vld [vmem:[#allocation14] sm:$0xff] }
 0x345   : > { %2522 = vmatprep.mubr.msk.f32.mxu1 %vm970_vm3, %v3551_v53 }
 0x404   : > { %v2499_v31 = vpop.f32.mrf.mxu1 }
 0x405   : > { %v1316_v32 = vmax.f32 %v2499_v31, 0.0  ;;  %v1940_v31 = vld [vmem:[#allocation16 + $0x60] sm:$0xff] }
 0x406   : > { %v1306_v34 = vpop.f32.mrf.mxu1 }
 0x407   : > { %v1315_v35 = vmax.f32 %v1306_v34, 0.0  ;;  %v1327_v36 = vmul.f32 %v1325_v29, %v1316_v32  ;;  %v1489_v37 = vmul.f32 %v1487_v23, %v1316_v32  ;;  %v1938_v34 = vld [vmem:[#allocation16 + $0x50] sm:$0xff] }
 0x409   : > { %2500 = vmatprep.subr.mxu0 %v1327_v36  ;;  %2518 = vmatprep.subr.mxu1 %v1489_v37  ;;  %v1326_v38 = vmul.f32 %v1325_v29, %v1315_v35  ;;  %v1488_v39 = vmul.f32 %v1487_v23, %v1315_v35  ;;  %v1942_v29 = vld [vmem:[#allocation16 + $0x70] sm:$0xff]  ;;  %v1941_v23 = vld [vmem:[#allocation16 + $0x68] sm:$0xff] }
 0x40a   : > { %2501 = vmatpush3.msra.mxu0 %v1327_v36  ;;  %2519 = vmatpush3.msra.mxu1 %v1489_v37  ;;  %v1936_v36 = vld [vmem:[#allocation16 + $0x40] sm:$0xff]  ;;  %v1935_v37 = vld [vmem:[#allocation16 + $0x38] sm:$0xff] }
 0x40b   : > { %2502 = vmatprep.subr.mxu0 %v1326_v38  ;;  %2520 = vmatprep.subr.mxu1 %v1488_v39 }
 0x40c   : > { %2503 = vmatpush3.msra.mxu0 %v1326_v38  ;;  %2521 = vmatpush3.msra.mxu1 %v1488_v39  ;;  %v1934_v38 = vld [vmem:[#allocation16 + $0x30] sm:$0xff]  ;;  %v1933_v39 = vld [vmem:[#allocation16 + $0x28] sm:$0xff] }
 0x40d   : > { %2505 = vmatmul.mubr.msk.f32.vlgmr.msra.gmra.mxu0 %vm970_vm3, %v3492_v33  ;;  %2507 = vmatprep.subr.mxu0 %v1321_v40 }
 0x40e   : > { %2508 = vmatpush3.msra.mxu0 %v1321_v40  ;;  %2515 = vmatprep.mubr.msk.f32.mxu0 %vm865_vm2, %v1315_v35  ;;  %v1937_v35 = vld [vmem:[#allocation16 + $0x48] sm:$0xff]  ;;  %v1932_v40 = vld [vmem:[#allocation16 + $0x20] sm:$0xff] }
 0x40f   : > { %2509 = vmatprep.subr.mxu0 %v1320_v41  ;;  %2523 = vmatmul.mubr.msk.f32.vlgmr.msra.gmra.mxu1 %vm970_vm3, %v3557_v55 }
 0x410   : > { %2510 = vmatpush3.msra.mxu0 %v1320_v41  ;;  %2525 = vmatprep.subr.mxu1 %v1578_v44  ;;  %v1931_v41 = vld [vmem:[#allocation16 + $0x18] sm:$0xff] }
 0x411   : > { %2511 = vmatprep.subr.mxu0 %v1319_v42  ;;  %2526 = vmatpush3.msra.mxu1 %v1578_v44  ;;  %v1928_v44 = vld [vmem:[#allocation16] sm:$0xff] }
 0x412   : > { %2512 = vmatpush3.msra.mxu0 %v1319_v42  ;;  %2527 = vmatprep.subr.mxu1 %v1577_v45  ;;  %v1930_v42 = vld [vmem:[#allocation16 + $0x10] sm:$0xff] }
 0x413   : > { %2513 = vmatprep.subr.mxu0 %v1318_v43  ;;  %2528 = vmatpush3.msra.mxu1 %v1577_v45 }
 0x414   : > { %2514 = vmatpush3.msra.mxu0 %v1318_v43  ;;  %2529 = vmatprep.subr.mxu1 %v1576_v46  ;;  %v1929_v43 = vld [vmem:[#allocation16 + $0x8] sm:$0xff] }
 0x415   : > { %2516 = vmatmul.mubr.msk.f32.vlgmr.msra.gmra.mxu0 %vm865_vm2, %v1316_v32  ;;  %2530 = vmatpush3.msra.mxu1 %v1576_v46  ;;  %v1939_v32 = vld [vmem:[#allocation16 + $0x58] sm:$0xff] }
 0x416   : > { %2540 = vmatprep.mubr.msk.f32.mxu0 %vm970_vm3, %v3470_v19  ;;  %2531 = vmatprep.subr.mxu1 %v1575_v48 }
 0x417   : > { %2532 = vmatpush3.msra.mxu1 %v1575_v48 }
 0x4cd   : > { %v2506_v49 = vpop.f32.mrf.mxu0 }
 0x4cf   : > { %v1394_v50 = vpop.f32.mrf.mxu0  ;;  %v2524_v52 = vpop.f32.mrf.mxu1 }
 0x4d1   : > { %v1556_v59 = vpop.f32.mrf.mxu1 }
 0x4d5   : > { %v2517_v51 = vpop.f32.mrf.mxu0 }
 0x4d6   : > { %v1481_v54 = vadd.f32 %v2517_v51, %v2506_v49  ;;  %v1923_v51 = vrot.slane %v3639_v1, %v3612_v11 }
 0x4d7   : > { %v1475_v19 = vpop.f32.mrf.mxu0 }
 0x4d8   : > { %v1566_v57 = vadd.f32 %v2524_v52, %v1481_v54  ;;  %v1476_v58 = vadd.f32 %v1475_v19, %v1394_v50 }
 0x4da   : > { %v1565_v60 = vadd.f32 %v1556_v59, %v1476_v58  ;;  %v1572_v61 = vadd.f32 %v1570_v56, %v1566_v57 }
 0x4dc   : > { %v1571_v62 = vadd.f32 %v1570_v56, %v1565_v60  ;;  %v1574_v0 = vmax.f32 %v1572_v61, 0.0 }
 0x4de   : > { %v1573_v63 = vmax.f32 %v1571_v62, 0.0 }
 0x4e0   : > { %2533 = vmatprep.mubr.msk.f32.mxu1 %vm865_vm2, %v1573_v63 }
 0x4e1   : > { %2534 = vmatmul.mubr.msk.f32.vlgmr.msra.gmra.mxu1 %vm865_vm2, %v1574_v0 }
 0x4e2   : > { %2582 = vmatprep.mubr.msk.f32.mxu1 %vm970_vm3, %v3551_v53 }
 0x5a1   : > { %v2535_v2 = vpop.f32.mrf.mxu1 }
 0x5a2   : > { %v1661_v3 = vmax.f32 %v2535_v2, 0.0 }
 0x5a3   : > { %v1651_v6 = vpop.f32.mrf.mxu1 }
 0x5a4   : > { %v3646_v7 = vadd.f32 %v1661_v3, %v3486_v27  ;;  %v1660_v8 = vmax.f32 %v1651_v6, 0.0  ;;  %v1679_v27 = vld [vmem:[#allocation14 + $0x70] sm:$0xff] }
 0x5a6   : > { %v1662_v53 = vadd.f32 %v1660_v8, %v3488_v30  ;;  %v1686_v9 = vmul.f32 %v1684_v4, %v3646_v7  ;;  %v1842_v10 = vmul.f32 %v1840_v5, %v3646_v7  ;;  %v1678_v30 = vld [vmem:[#allocation14 + $0x68] sm:$0xff] }
 0x5a8   : > { %2536 = vmatprep.subr.mxu0 %v1686_v9  ;;  %2578 = vmatprep.subr.mxu1 %v1842_v10  ;;  %v1685_v12 = vmul.f32 %v1684_v4, %v1662_v53  ;;  %v1841_v13 = vmul.f32 %v1840_v5, %v1662_v53 }
 0x5a9   : > { %2537 = vmatpush3.msra.mxu0 %v1686_v9  ;;  %2579 = vmatpush3.msra.mxu1 %v1842_v10 }
 0x5aa   : > { %2538 = vmatprep.subr.mxu0 %v1685_v12  ;;  %2580 = vmatprep.subr.mxu1 %v1841_v13 }
 0x5ab   : > { %2539 = vmatpush3.msra.mxu0 %v1685_v12  ;;  %2581 = vmatpush3.msra.mxu1 %v1841_v13 }
 0x5ac   : > { %2541 = vmatmul.mubr.msk.f32.vlgmr.msra.gmra.mxu0 %vm970_vm3, %v3492_v33  ;;  %2543 = vmatprep.subr.mxu0 %v1680_v22  ;;  %v1673_v33 = vld [vmem:[#allocation14 + $0x40] sm:$0xff] }
 0x5ad   : > { %2544 = vmatpush3.msra.mxu0 %v1680_v22  ;;  %2575 = vmatprep.mubr.f32.mxu0 %v1662_v53 }
 0x5ae   : > { %2545 = vmatprep.subr.mxu0 %v1679_v27  ;;  %2583 = vmatmul.mubr.msk.f32.vlgmr.msra.gmra.mxu1 %vm970_vm3, %v3557_v55  ;;  %v1671_v55 = vld [vmem:[#allocation14 + $0x30] sm:$0xff] }
 0x5af   : > { %2546 = vmatpush3.msra.mxu0 %v1679_v27  ;;  %2585 = vmatprep.subr.mxu1 %v1943_v21 }
 0x5b0   : > { %2547 = vmatprep.subr.mxu0 %v1678_v30  ;;  %2586 = vmatpush3.msra.mxu1 %v1943_v21 }
 0x5b1   : > { %2548 = vmatpush3.msra.mxu0 %v1678_v30  ;;  %2587 = vmatprep.subr.mxu1 %v1942_v29 }
 0x5b2   : > { %2549 = vmatprep.subr.mxu0 %v1677_v47  ;;  %2588 = vmatpush3.msra.mxu1 %v1942_v29 }
 0x5b3   : > { %2550 = vmatpush3.msra.mxu0 %v1677_v47  ;;  %2589 = vmatprep.subr.mxu1 %v1941_v23 }
 0x5b4   : > { %2551 = vmatprep.subr.mxu0 %v1676_v14  ;;  %2590 = vmatpush3.msra.mxu1 %v1941_v23 }
 0x5b5   : > { %2552 = vmatpush3.msra.mxu0 %v1676_v14  ;;  %2591 = vmatprep.subr.mxu1 %v1940_v31 }
 0x5b6   : > { %2553 = vmatprep.subr.mxu0 %v1675_v15  ;;  %2592 = vmatpush3.msra.mxu1 %v1940_v31 }
 0x5b7   : > { %2554 = vmatpush3.msra.mxu0 %v1675_v15  ;;  %2593 = vmatprep.subr.mxu1 %v1939_v32 }
 0x5b8   : > { %2555 = vmatprep.subr.mxu0 %v1674_v16  ;;  %2594 = vmatpush3.msra.mxu1 %v1939_v32 }
 0x5b9   : > { %2556 = vmatpush3.msra.mxu0 %v1674_v16  ;;  %2595 = vmatprep.subr.mxu1 %v1938_v34 }
 0x5ba   : > { %2557 = vmatprep.subr.mxu0 %v1673_v33  ;;  %2596 = vmatpush3.msra.mxu1 %v1938_v34 }
 0x5bb   : > { %2558 = vmatpush3.msra.mxu0 %v1673_v33  ;;  %2597 = vmatprep.subr.mxu1 %v1937_v35 }
 0x5bc   : > { %2559 = vmatprep.subr.mxu0 %v1672_v17  ;;  %2598 = vmatpush3.msra.mxu1 %v1937_v35 }
 0x5bd   : > { %2560 = vmatpush3.msra.mxu0 %v1672_v17  ;;  %2599 = vmatprep.subr.mxu1 %v1936_v36 }
 0x5be   : > { %2561 = vmatprep.subr.mxu0 %v1671_v55  ;;  %2600 = vmatpush3.msra.mxu1 %v1936_v36 }
 0x5bf   : > { %2562 = vmatpush3.msra.mxu0 %v1671_v55  ;;  %2601 = vmatprep.subr.mxu1 %v1935_v37 }
 0x5c0   : > { %2563 = vmatprep.subr.mxu0 %v1670_v18  ;;  %2602 = vmatpush3.msra.mxu1 %v1935_v37 }
 0x5c1   : > { %2564 = vmatpush3.msra.mxu0 %v1670_v18  ;;  %2603 = vmatprep.subr.mxu1 %v1934_v38 }
 0x5c2   : > { %2565 = vmatprep.subr.mxu0 %v1669_v20  ;;  %2604 = vmatpush3.msra.mxu1 %v1934_v38 }
 0x5c3   : > { %2566 = vmatpush3.msra.mxu0 %v1669_v20  ;;  %2605 = vmatprep.subr.mxu1 %v1933_v39 }
 0x5c4   : > { %2567 = vmatprep.subr.mxu0 %v1668_v24  ;;  %2606 = vmatpush3.msra.mxu1 %v1933_v39 }
 0x5c5   : > { %2568 = vmatpush3.msra.mxu0 %v1668_v24  ;;  %2607 = vmatprep.subr.mxu1 %v1932_v40 }
 0x5c6   : > { %2569 = vmatprep.subr.mxu0 %v1667_v25  ;;  %2608 = vmatpush3.msra.mxu1 %v1932_v40 }
 0x5c7   : > { %2570 = vmatpush3.msra.mxu0 %v1667_v25  ;;  %2609 = vmatprep.subr.mxu1 %v1931_v41 }
 0x5c8   : > { %2571 = vmatprep.subr.mxu0 %v1666_v26  ;;  %2610 = vmatpush3.msra.mxu1 %v1931_v41 }
 0x5c9   : > { %2572 = vmatpush3.msra.mxu0 %v1666_v26  ;;  %2611 = vmatprep.subr.mxu1 %v1930_v42 }
 0x5ca   : > { %2573 = vmatprep.subr.mxu0 %v1665_v28  ;;  %2612 = vmatpush3.msra.mxu1 %v1930_v42 }
 0x5cb   : > { %2574 = vmatpush3.msra.mxu0 %v1665_v28  ;;  %2613 = vmatprep.subr.mxu1 %v1929_v43 }
 0x5cc   : > { %2576 = vmatmul.mubr.f32.vlgmr.msra.gmra.mxu0 %v3646_v7  ;;  %2614 = vmatpush3.msra.mxu1 %v1929_v43 }
 0x5cd   : > { %2615 = vmatprep.subr.mxu1 %v1928_v44 }
 0x5ce   : > { %2616 = vmatpush3.msra.mxu1 %v1928_v44 }
 0x66c   : > { %v2542_v45 = vpop.f32.mrf.mxu0 }
 0x66e   : > { %v1753_v46 = vpop.f32.mrf.mxu0  ;;  %v2584_v49 = vpop.f32.mrf.mxu1 }
 0x670   : > { %v1909_v19 = vpop.f32.mrf.mxu1 }
 0x68c   : > { %v2577_v48 = vpop.f32.mrf.mxu0 }
 0x68d   : > { %v1834_v50 = vadd.f32 %v2577_v48, %v2542_v45 }
 0x68e   : > { %v1828_v52 = vpop.f32.mrf.mxu0 }
 0x68f   : > { %v1919_v54 = vadd.f32 %v2584_v49, %v1834_v50  ;;  %v1829_v56 = vadd.f32 %v1828_v52, %v1753_v46 }
 0x691   : > { %v1918_v57 = vadd.f32 %v1909_v19, %v1829_v56  ;;  %v1925_v58 = vadd.f32 %v1923_v51, %v1919_v54 }
 0x693   : > { %v1924_v59 = vadd.f32 %v1923_v51, %v1918_v57  ;;  %v1927_v61 = vmax.f32 %v1925_v58, 0.0 }
 0x695   : > { %v1926_v60 = vmax.f32 %v1924_v59, 0.0 }
 0x697   : > { %2617 = vmatprep.mubr.f32.mxu1 %v1926_v60 }
 0x698   : > { %2618 = vmatmul.mubr.f32.vlgmr.msra.gmra.mxu1 %v1927_v61 }
 0x758   : > { %v2619_v62 = vpop.f32.mrf.mxu1 }
 0x759   : > { %v2020_v63 = vmax.f32 %v2619_v62, 0.0 }
 0x75a   : > { %v2010_v11 = vpop.f32.mrf.mxu1 }
 0x75b   : > { %2022 = vst [vmem:[%s677_s6 + $0x8] sm:$0xff] %v2020_v63  ;;  %v2019_v0 = vmax.f32 %v2010_v11, 0.0 }
 0x75d   : > { %2021 = vst [vmem:[%s677_s6] sm:$0xff] %v2019_v0 }
 0x75e   : > { %2997 = shalt.err (!%p2994_p8)
}
 0x75f   : > { %s2998_s26 = scalar_lea.hbm %s3666_s3, 256  ;;  %s3002_s23 = scalar_lea.hbm %s3775_s5, 512 }
 0x760   : > { %p2999_p6 = scmp.ne.s32.totalorder %s3666_s3, %s2998_s26  ;;  %p3003_p5 = scmp.lt.s32.totalorder %s3666_s3, %s3775_s5 }
 0x761   : > { %p3004_p10 = scmp.lt.s32.totalorder %s3002_s23, %s2998_s26 }
 0x762   : > { %p3000_p11 = pnand %p2999_p6, %p3776_p13 }
 0x763   : > { %p3005_p9 = por %p3004_p10, %p3003_p5 }
 0x764   : > { %p3001_p2 = pneg %p3000_p11 }
 0x766   : > { %p3006_p12 = pnand %p3005_p9, %p3001_p2 }
 0x768   : > { %3009 = shalt.err (!%p3006_p12)
}
 0x769   : > { %s3082_s15 = smov 128   ;;  %s3083_s10 = smov 8  }
 0x76a   : > { %2652 = dma.vmem_to_hbm [thread:$0]  (%p3776_p13), %s3661_s13, 256, %s3666_s3, %s2024_s17, %s3082_s15, %s3082_s15, %s3083_s10  }
 0x76b PF: > { %s2052_s28 = sand.u32 1, %s3056_s21   ;;  %p3777_p1 = scmp.ne.s32.totalorder %s3759_s30, 0 }
 0x76c   : > { %p3778_p3 = scmp.ge.s32.totalorder %s3068_s24, 2  ;;  %s2053_s27 = scalar_lea.sflag [#allocation4], %s2052_s28 }
 0x76e   : > { %p2684_p0 = pnand %p3778_p3, %p3777_p1 }
 0x770   : > { %p2685_p4 = pneg %p2684_p0 }
 0x772   : > { %3051 = dma.done.wait (%p2685_p4), %s2053_s27, 256  }
 0x773   : > { %3053 = vsyncadd (%p2685_p4), %s2053_s27, 4294967040  ;;  %s3779_s20 = sld [smem:[#allocation25_spill]]  ;;  %p35_p7 = scmp.ge.s32.totalorder %s3300_s19, 4  }
 0x774   : > { %s3780_s23 = sld [smem:[#allocation26_spill]]  ;;  %s3781_s21 = smov %s3060_s22 }
 0x775   : > { %s3783_s24 = smov %s3300_s19  ;;  %37 = sbr.rel (!%p35_p7) target bundleno = 21 (0x15), region = 170 }
 0x779   : > { %s3782_s22 = smov %s3779_s20 }
 0x77a   :  { %2058 = vsyncpa [#allocation3], 1 }
 0x77b   :  { %2060 = vsyncpa [#allocation3 + $0x1], 1 }
 0x77c   :  { %2061 = vsyncpa [#allocation6], 1 }
 0x77d   :  { %2063 = vsyncpa [#allocation6 + $0x1], 1 }
 0x77e   :  { %2064 = vsyncpa [#allocation9], 1 }
 0x77f   :  { %2065 = vsyncpa [#allocation12], 1 }
 0x780   :  { %2066 = vsyncpa [#allocation15], 1 }
 0x781   :  { %2067 = vsyncpa [#allocation4], 1 }
 0x782   :  { %2069 = vsyncpa [#allocation4 + $0x1], 1 }

</bundles_post_ra>
